<compile_context>
chip_gen: v5e
topology: v5e:2x2
jax: 0.10.0
libtpu: 0.0.40
codegen_flags: <defaults>
</compile_context>

<pallas_src>
import math

import jax
import jax.numpy as jnp
from jax.experimental import pallas as pl
from jax.experimental.pallas import tpu as pltpu

N_LAYERS = 2     # N in Encoder(encoder_block, N)
N_HEADS = 4
EPS = 1e-6       # LayerNorm eps (Annotated-Transformer custom LayerNorm)

PER_LAYER_PARAMS = ["wq", "bq", "wk", "bk", "wv", "bv", "wo", "bo",
                    "ln1g", "ln1b", "ln2g", "ln2b",
                    "w1", "b1", "w2", "b2"]
FINAL_PARAMS = ["fg", "fb"]
PARAM_ORDER = PER_LAYER_PARAMS + FINAL_PARAMS
MATMUL_PARAMS = {"wq", "wk", "wv", "wo", "w1", "w2"}   # bf16 operands for MXU


def _layer_norm(x, g, b, recip=None):
    # Annotated-Transformer LayerNorm: a_2 * (x - mean) / (std + eps) + b_2
    # torch .std() is unbiased -> divide by (D - 1); eps is added to *std*.
    # `recip` lets the in-kernel version route the divide to the EUP slot.
    mean = jnp.mean(x, axis=-1, keepdims=True)
    d = x - mean
    var = jnp.sum(d * d, axis=-1, keepdims=True) / (x.shape[-1] - 1)
    std = jnp.sqrt(var)
    denom = std + EPS
    if recip is None:
        return g * d / denom + b
    return g * (d * recip(denom)) + b


def encoder_kernel(x_ref,
                   wq_ref, bq_ref, wk_ref, bk_ref, wv_ref, bv_ref,
                   wo_ref, bo_ref,
                   ln1g_ref, ln1b_ref, ln2g_ref, ln2b_ref,
                   w1_ref, b1_ref, w2_ref, b2_ref,
                   fg_ref, fb_ref,
                   out_ref):
    layer = pl.program_id(1)
    last = pl.num_programs(1) - 1

    # EUP reciprocal (exact) for LayerNorm denominators.
    recip = lambda t: pl.reciprocal(t, approx=False)

    # Residual-stream carry lives in out_ref: its block index is constant
    # across the (innermost, "arbitrary") layer axis so the block stays
    # resident in VMEM across layer steps and is only DMA'd back to HBM when
    # the batch-tile index changes.
    # NOTE: correctness relies on (a) the layer axis being the innermost grid
    # axis and (b) re-priming the carry at layer == 0 for every batch tile.
    @pl.when(layer == 0)
    def _():
        out_ref[...] = x_ref[...]

    bt, seq, d_model = out_ref.shape
    n_heads = N_HEADS
    d_head = d_model // n_heads
    rows = bt * seq
    scale = 1.0 / math.sqrt(d_head)

    x = out_ref[...].reshape(rows, d_model)             # f32 residual stream

    # ---------------- self-attention sublayer (pre-norm residual) ----------
    h = _layer_norm(x, ln1g_ref[0], ln1b_ref[0], recip)
    hb = h.astype(jnp.bfloat16)

    def project_heads(w_ref, b_ref):
        # dot -> +bias -> head view -> bf16 fused per projection so the f32
        # (rows, D) slab is dead before the next projection is issued.
        t = jnp.dot(hb, w_ref[0], preferred_element_type=jnp.float32) + b_ref[0]
        t = t.reshape(bt, seq, n_heads, d_head)
        # TODO(synk): drop this head-major relayout (XLU transpose) once the
        # contraction can run natively on (bt, seq, H, Dh).
        t = jnp.transpose(t, (0, 2, 1, 3)).reshape(bt * n_heads, seq, d_head)
        return t.astype(jnp.bfloat16)

    qh = project_heads(wq_ref, bq_ref)
    kh = project_heads(wk_ref, bk_ref)
    vh = project_heads(wv_ref, bv_ref)

    # All heads in one batched contraction; softmax kept in f32.
    # (MXU note: these contract over d_head / emit d_head lanes; keep seq a
    # multiple of 128 at real sizes so the scores lane dim stays dense.)
    # TODO(synk): flash-style KV-tile loop for long S (avoids O(S^2) VMEM).
    s = jnp.einsum("nqd,nkd->nqk", qh, kh,
                   preferred_element_type=jnp.float32) * scale
    s = s - jnp.max(s, axis=-1, keepdims=True)
    p = jnp.exp(s)
    p = p * pl.reciprocal(jnp.sum(p, axis=-1, keepdims=True), approx=True)
    ctx = jnp.einsum("nqk,nkd->nqd", p.astype(jnp.bfloat16), vh,
                     preferred_element_type=jnp.float32)

    ctx = ctx.reshape(bt, n_heads, seq, d_head)
    ctx = jnp.transpose(ctx, (0, 2, 1, 3)).reshape(rows, d_model)
    attn = jnp.dot(ctx.astype(jnp.bfloat16), wo_ref[0],
                   preferred_element_type=jnp.float32) + bo_ref[0]
    x = x + attn                                        # dropout == identity

    # ---------------- feed-forward sublayer (pre-norm residual) ------------
    h2 = _layer_norm(x, ln2g_ref[0], ln2b_ref[0], recip)
    f = jnp.dot(h2.astype(jnp.bfloat16), w1_ref[0],
                preferred_element_type=jnp.float32) + b1_ref[0]
    f = jnp.maximum(f, 0.0)
    f = jnp.dot(f.astype(jnp.bfloat16), w2_ref[0],
                preferred_element_type=jnp.float32) + b2_ref[0]
    x = x + f

    # Carry to the next layer step / finalize with the Encoder's final norm.
    @pl.when(layer < last)
    def _():
        out_ref[...] = x.reshape(bt, seq, d_model)

    @pl.when(layer == last)
    def _():
        out_ref[...] = _layer_norm(x, fg_ref[0], fb_ref[0], recip).reshape(
            bt, seq, d_model)


def make_params(key, d_model, d_ff, n_layers=N_LAYERS):
    ks = jax.random.split(key, 18)
    s = 0.05

    def rnd(i, shape, scale=s):
        return jax.random.normal(ks[i], shape, jnp.float32) * scale

    return {
        "wq": rnd(0, (n_layers, d_model, d_model)),
        "wk": rnd(1, (n_layers, d_model, d_model)),
        "wv": rnd(2, (n_layers, d_model, d_model)),
        "wo": rnd(3, (n_layers, d_model, d_model)),
        "w1": rnd(4, (n_layers, d_model, d_ff)),
        "w2": rnd(5, (n_layers, d_ff, d_model)),
        "bq": rnd(6, (n_layers, 1, d_model), 0.02),
        "bk": rnd(7, (n_layers, 1, d_model), 0.02),
        "bv": rnd(8, (n_layers, 1, d_model), 0.02),
        "bo": rnd(9, (n_layers, 1, d_model), 0.02),
        "b1": rnd(10, (n_layers, 1, d_ff), 0.02),
        "b2": rnd(11, (n_layers, 1, d_model), 0.02),
        "ln1g": 1.0 + rnd(12, (n_layers, 1, d_model), 0.02),
        "ln1b": rnd(13, (n_layers, 1, d_model), 0.02),
        "ln2g": 1.0 + rnd(14, (n_layers, 1, d_model), 0.02),
        "ln2b": rnd(15, (n_layers, 1, d_model), 0.02),
        "fg": 1.0 + rnd(16, (1, 1, d_model), 0.02),
        "fb": rnd(17, (1, 1, d_model), 0.02),
    }


def _device_vmem_caps():
    """(rows_target, vmem_cap_bytes) tuned per TPU generation.

    v7x has 64 MiB VMEM per TensorCore -> smaller row target, cap well below
    physical to leave room for Mosaic internal scratch and double-buffered
    I/O blocks.  v4/v5e/v6e have 128 MiB -> larger row target + higher cap
    (less weight re-streaming per layer).
    """
    phys = None
    try:
        info = pltpu.get_tpu_info()
        phys = int(getattr(info, "vmem_capacity_bytes", 0) or 0) or None
    except Exception:
        phys = None
    if phys is None:
        kind = ""
        try:
            kind = jax.devices()[0].device_kind.lower()
        except Exception:
            pass
        if "v7" in kind:
            phys = 64 * 1024 * 1024
        elif any(t in kind for t in ("v6", "v5", "v4")):
            phys = 128 * 1024 * 1024
        else:
            phys = 64 * 1024 * 1024          # conservative default
    if phys <= 80 * 1024 * 1024:             # v7x-class
        return 384, 52 * 1024 * 1024
    return 768, 100 * 1024 * 1024            # v4 / v5e / v6e class


def _vmem_estimate(bt, seq, d_model, d_ff, n_heads):
    """Rough per-grid-step VMEM need (bytes), including attention scores."""
    per_layer_w = 2 * (4 * d_model * d_model + 2 * d_model * d_ff)   # bf16
    io = 2 * 2 * (bt * seq * d_model * 4)        # double-buffered x-in + out
    act = 4 * bt * seq * max(d_model, d_ff)      # one f32 activation slab
    scores = bt * n_heads * seq * seq * (4 + 2)  # f32 scores + bf16 probs
    # 2x weights (double-buffered layer stream) + a handful of live slabs.
    return 2 * per_layer_w + io + 12 * act + 2 * scores


def _pick_batch_tile(batch, seq, d_model, d_ff, n_heads, rows_target, vmem_cap):
    """Largest divisor of `batch` whose tile gives ~rows_target matmul rows
    and fits the per-generation VMEM cap, keeping >= 2 batch tiles when
    possible so both v7x TensorCores get work."""
    cap_rows = max(1, rows_target // max(seq, 1))
    divisors = [c for c in range(1, batch + 1) if batch % c == 0]
    candidates = [c for c in divisors if c <= cap_rows]
    bt = max(candidates) if candidates else 1
    if bt == batch and batch > 1:
        # TODO(synk): when batch == 1, split the seq axis instead so v7x's
        # second TensorCore is not idle.
        bt = max(c for c in divisors if c < batch)
    while bt > 1 and _vmem_estimate(bt, seq, d_model, d_ff, n_heads) > vmem_cap:
        smaller = [c for c in divisors if c < bt]
        bt = max(smaller) if smaller else 1
    return bt


def encoder_forward(x, params):
    batch, seq, d_model = x.shape
    assert d_model % N_HEADS == 0, "d_model must be divisible by N_HEADS"
    n_layers = params["wq"].shape[0]
    d_ff = params["w1"].shape[-1]

    rows_target, vmem_cap = _device_vmem_caps()
    bt = _pick_batch_tile(batch, seq, d_model, d_ff, N_HEADS,
                          rows_target, vmem_cap)
    # Layer axis MUST stay innermost: the out_ref residual carry depends on it.
    grid = (batch // bt, n_layers)

    args = []
    in_specs = [pl.BlockSpec((bt, seq, d_model), lambda b, l: (b, 0, 0))]
    for name in PER_LAYER_PARAMS:
        w = params[name]
        if name in MATMUL_PARAMS:
            w = w.astype(jnp.bfloat16)       # bf16 MXU operands, f32 accum
        args.append(w)
        # One layer's slice per grid step; the pipeline double-buffers it so
        # the next layer's weights stream in behind this layer's compute.
        # (On v5e/v6e with spare VMEM, pipeline_mode=pl.Buffered(3) on the
        #  w1/w2 specs can hide the FFN-weight DMA further.)
        in_specs.append(
            pl.BlockSpec((1,) + w.shape[1:],
                         lambda b, l, _n=w.ndim: (l,) + (0,) * (_n - 1)))
    for name in FINAL_PARAMS:
        w = params[name]
        args.append(w)
        in_specs.append(
            pl.BlockSpec(w.shape, lambda b, l, _n=w.ndim: (0,) * _n))

    # out is also the residual carry: block index constant across the layer
    # axis -> resident in VMEM, written back only when the batch tile changes.
    out_spec = pl.BlockSpec((bt, seq, d_model), lambda b, l: (b, 0, 0))

    vmem_needed = _vmem_estimate(bt, seq, d_model, d_ff, N_HEADS)
    vmem_limit = int(min(vmem_cap, max(16 * 1024 * 1024, vmem_needed)))

    return pl.pallas_call(
        encoder_kernel,
        out_shape=jax.ShapeDtypeStruct((batch, seq, d_model), jnp.float32),
        grid_spec=pltpu.PrefetchScalarGridSpec(
            num_scalar_prefetch=0,
            grid=grid,
            in_specs=in_specs,
            out_specs=out_spec,
        ),
        compiler_params=pltpu.CompilerParams(
            dimension_semantics=("parallel", "arbitrary"),
            vmem_limit_bytes=vmem_limit),
    )(x, *args)


def encoder_reference(x, params):
    """Pure-JAX reference of the same math (f32, HIGHEST precision)."""
    hi = jax.lax.Precision.HIGHEST
    batch, seq, d_model = x.shape
    n_layers = params["wq"].shape[0]
    d_head = d_model // N_HEADS
    out = x
    for l in range(n_layers):
        h = _layer_norm(out, params["ln1g"][l], params["ln1b"][l])
        q = jnp.einsum("bsd,de->bse", h, params["wq"][l], precision=hi) + params["bq"][l]
        k = jnp.einsum("bsd,de->bse", h, params["wk"][l], precision=hi) + params["bk"][l]
        v = jnp.einsum("bsd,de->bse", h, params["wv"][l], precision=hi) + params["bv"][l]
        q = q.reshape(batch, seq, N_HEADS, d_head)
        k = k.reshape(batch, seq, N_HEADS, d_head)
        v = v.reshape(batch, seq, N_HEADS, d_head)
        s = jnp.einsum("bqhd,bkhd->bhqk", q, k, precision=hi) / math.sqrt(d_head)
        p = jax.nn.softmax(s, axis=-1)
        a = jnp.einsum("bhqk,bkhd->bqhd", p, v, precision=hi).reshape(batch, seq, d_model)
        a = jnp.einsum("bsd,de->bse", a, params["wo"][l], precision=hi) + params["bo"][l]
        out = out + a
        h2 = _layer_norm(out, params["ln2g"][l], params["ln2b"][l])
        f = jnp.maximum(
            jnp.einsum("bsd,df->bsf", h2, params["w1"][l], precision=hi) + params["b1"][l],
            0.0)
        f = jnp.einsum("bsf,fd->bsd", f, params["w2"][l], precision=hi) + params["b2"][l]
        out = out + f
    return _layer_norm(out, params["fg"][0], params["fb"][0])


if __name__ == "__main__":
    B, S, D, D_FF = 4, 8, 32, 64
    key = jax.random.PRNGKey(0)
    kx, kp = jax.random.split(key)
    x = jax.random.normal(kx, (B, S, D), jnp.float32)
    params = make_params(kp, D, D_FF)

    out = encoder_forward(x, params)
    out = jax.block_until_ready(out)

    ref = encoder_reference(x, params)
    assert out.shape == (B, S, D)
    max_err = float(jnp.max(jnp.abs(out - ref)))
    assert jnp.allclose(out, ref, atol=2e-2, rtol=2e-2), (
        f"mismatch vs reference (max abs err {max_err})")

    print("KERNEL_OK")
</pallas_src>

<mosaic_0001>
module attributes {stable_mosaic.version = 11 : i64} {
  func.func @encoder_kernel(%arg0: i32, %arg1: i32, %arg2: memref<2x8x32xf32, #tpu.memory_space<vmem>>, %arg3: memref<1x32x32xbf16, #tpu.memory_space<vmem>>, %arg4: memref<1x1x32xf32, #tpu.memory_space<vmem>>, %arg5: memref<1x32x32xbf16, #tpu.memory_space<vmem>>, %arg6: memref<1x1x32xf32, #tpu.memory_space<vmem>>, %arg7: memref<1x32x32xbf16, #tpu.memory_space<vmem>>, %arg8: memref<1x1x32xf32, #tpu.memory_space<vmem>>, %arg9: memref<1x32x32xbf16, #tpu.memory_space<vmem>>, %arg10: memref<1x1x32xf32, #tpu.memory_space<vmem>>, %arg11: memref<1x1x32xf32, #tpu.memory_space<vmem>>, %arg12: memref<1x1x32xf32, #tpu.memory_space<vmem>>, %arg13: memref<1x1x32xf32, #tpu.memory_space<vmem>>, %arg14: memref<1x1x32xf32, #tpu.memory_space<vmem>>, %arg15: memref<1x32x64xbf16, #tpu.memory_space<vmem>>, %arg16: memref<1x1x64xf32, #tpu.memory_space<vmem>>, %arg17: memref<1x64x32xbf16, #tpu.memory_space<vmem>>, %arg18: memref<1x1x32xf32, #tpu.memory_space<vmem>>, %arg19: memref<1x1x32xf32, #tpu.memory_space<vmem>>, %arg20: memref<1x1x32xf32, #tpu.memory_space<vmem>>, %arg21: memref<2x8x32xf32, #tpu.memory_space<vmem>>) attributes {dimension_semantics = [#tpu.dimension_semantics<parallel>, #tpu.dimension_semantics<arbitrary>], iteration_bounds = array<i64: 2, 2>, scalar_prefetch = 0 : i64, scratch_operands = 0 : i64, tpu.core_type = #tpu.core_type<tc>, window_params = [{transform_indices = @transform_0, window_bounds = array<i64: 2, 8, 32>}, {transform_indices = @transform_1, window_bounds = array<i64: 1, 32, 32>}, {transform_indices = @transform_2, window_bounds = array<i64: 1, 1, 32>}, {transform_indices = @transform_3, window_bounds = array<i64: 1, 32, 32>}, {transform_indices = @transform_4, window_bounds = array<i64: 1, 1, 32>}, {transform_indices = @transform_5, window_bounds = array<i64: 1, 32, 32>}, {transform_indices = @transform_6, window_bounds = array<i64: 1, 1, 32>}, {transform_indices = @transform_7, window_bounds = array<i64: 1, 32, 32>}, {transform_indices = @transform_8, window_bounds = array<i64: 1, 1, 32>}, {transform_indices = @transform_9, window_bounds = array<i64: 1, 1, 32>}, {transform_indices = @transform_10, window_bounds = array<i64: 1, 1, 32>}, {transform_indices = @transform_11, window_bounds = array<i64: 1, 1, 32>}, {transform_indices = @transform_12, window_bounds = array<i64: 1, 1, 32>}, {transform_indices = @transform_13, window_bounds = array<i64: 1, 32, 64>}, {transform_indices = @transform_14, window_bounds = array<i64: 1, 1, 64>}, {transform_indices = @transform_15, window_bounds = array<i64: 1, 64, 32>}, {transform_indices = @transform_16, window_bounds = array<i64: 1, 1, 32>}, {pipeline_mode = #tpu.pipeline_mode<synchronous>, transform_indices = @transform_17, window_bounds = array<i64: 1, 1, 32>}, {pipeline_mode = #tpu.pipeline_mode<synchronous>, transform_indices = @transform_18, window_bounds = array<i64: 1, 1, 32>}, {transform_indices = @transform_19, window_bounds = array<i64: 2, 8, 32>}]} {
    %c0_i32 = arith.constant 0 : i32
    %0 = arith.cmpi eq, %arg1, %c0_i32 : i32
    %1 = arith.extui %0 : i1 to i32
    %c0_i32_0 = arith.constant 0 : i32
    %2 = arith.cmpi ne, %1, %c0_i32_0 : i32
    scf.if %2 {
      %c0_75 = arith.constant 0 : index
      %c0_76 = arith.constant 0 : index
      %c0_77 = arith.constant 0 : index
      %141 = vector.load %arg2[%c0_75, %c0_76, %c0_77] : memref<2x8x32xf32, #tpu.memory_space<vmem>>, vector<2x8x32xf32>
      %c0_78 = arith.constant 0 : index
      %c0_79 = arith.constant 0 : index
      %c0_80 = arith.constant 0 : index
      %142 = vector.load %arg21[%c0_78, %c0_79, %c0_80] : memref<2x8x32xf32, #tpu.memory_space<vmem>>, vector<2x8x32xf32>
      tpu.vector_store %arg21[%c0_78, %c0_79, %c0_80], %141 {strides = array<i32>} : memref<2x8x32xf32, #tpu.memory_space<vmem>>, vector<2x8x32xf32>,
    } else {
    }
    %c0 = arith.constant 0 : index
    %c0_1 = arith.constant 0 : index
    %c0_2 = arith.constant 0 : index
    %3 = vector.load %arg21[%c0, %c0_1, %c0_2] : memref<2x8x32xf32, #tpu.memory_space<vmem>>, vector<2x8x32xf32>
    %4 = vector.shape_cast %3 : vector<2x8x32xf32> to vector<16x32xf32>
    %c0_3 = arith.constant 0 : index
    %c0_4 = arith.constant 0 : index
    %c0_5 = arith.constant 0 : index
    %5 = vector.load %arg11[%c0_3, %c0_4, %c0_5] : memref<1x1x32xf32, #tpu.memory_space<vmem>>, vector<1x1x32xf32>
    %6 = vector.shape_cast %5 : vector<1x1x32xf32> to vector<1x32xf32>
    %c0_6 = arith.constant 0 : index
    %c0_7 = arith.constant 0 : index
    %c0_8 = arith.constant 0 : index
    %7 = vector.load %arg12[%c0_6, %c0_7, %c0_8] : memref<1x1x32xf32, #tpu.memory_space<vmem>>, vector<1x1x32xf32>
    %8 = vector.shape_cast %7 : vector<1x1x32xf32> to vector<1x32xf32>
    %cst = arith.constant dense<0.000000e+00> : vector<16xf32>
    %9 = vector.multi_reduction <add>, %4, %cst [1] : vector<16x32xf32> to vector<16xf32>
    %10 = vector.shape_cast %9 : vector<16xf32> to vector<16x1xf32>
    %cst_9 = arith.constant 3.200000e+01 : f32
    %11 = vector.broadcast %cst_9 : f32 to vector<16x1xf32>
    %12 = arith.divf %10, %11 : vector<16x1xf32>
    %13 = vector.broadcast %12 : vector<16x1xf32> to vector<16x32xf32>
    %14 = arith.subf %4, %13 : vector<16x32xf32>
    %15 = arith.mulf %14, %14 : vector<16x32xf32>
    %cst_10 = arith.constant dense<0.000000e+00> : vector<16xf32>
    %16 = vector.multi_reduction <add>, %15, %cst_10 [1] : vector<16x32xf32> to vector<16xf32>
    %17 = vector.shape_cast %16 : vector<16xf32> to vector<16x1xf32>
    %cst_11 = arith.constant 3.100000e+01 : f32
    %18 = vector.broadcast %cst_11 : f32 to vector<16x1xf32>
    %19 = arith.divf %17, %18 : vector<16x1xf32>
    %20 = math.sqrt %19 : vector<16x1xf32>
    %cst_12 = arith.constant 9.99999997E-7 : f32
    %21 = vector.broadcast %cst_12 : f32 to vector<16x1xf32>
    %22 = arith.addf %20, %21 : vector<16x1xf32>
    %23 = tpu.reciprocal %22 : vector<16x1xf32> -> vector<16x1xf32>
    %24 = vector.broadcast %23 : vector<16x1xf32> to vector<16x32xf32>
    %25 = arith.mulf %14, %24 : vector<16x32xf32>
    %26 = vector.broadcast %6 : vector<1x32xf32> to vector<16x32xf32>
    %27 = arith.mulf %26, %25 : vector<16x32xf32>
    %28 = vector.broadcast %8 : vector<1x32xf32> to vector<16x32xf32>
    %29 = arith.addf %27, %28 : vector<16x32xf32>
    %30 = arith.truncf %29 : vector<16x32xf32> to vector<16x32xbf16>
    %c0_13 = arith.constant 0 : index
    %c0_14 = arith.constant 0 : index
    %c0_15 = arith.constant 0 : index
    %31 = vector.load %arg3[%c0_13, %c0_14, %c0_15] : memref<1x32x32xbf16, #tpu.memory_space<vmem>>, vector<1x32x32xbf16>
    %32 = vector.shape_cast %31 : vector<1x32x32xbf16> to vector<32x32xbf16>
    %cst_16 = arith.constant dense<0.000000e+00> : vector<16x32xf32>
    %33 = tpu.matmul %30, %32, %cst_16 {dimension_numbers = #tpu.dot_dimension_numbers<[1], [0], [0], [1], [0, 0, 1, 1], [], []>} : vector<16x32xbf16>, vector<32x32xbf16>, vector<16x32xf32> -> vector<16x32xf32>
    %c0_17 = arith.constant 0 : index
    %c0_18 = arith.constant 0 : index
    %c0_19 = arith.constant 0 : index
    %34 = vector.load %arg4[%c0_17, %c0_18, %c0_19] : memref<1x1x32xf32, #tpu.memory_space<vmem>>, vector<1x1x32xf32>
    %35 = vector.shape_cast %34 : vector<1x1x32xf32> to vector<1x32xf32>
    %36 = vector.broadcast %35 : vector<1x32xf32> to vector<16x32xf32>
    %37 = arith.addf %33, %36 : vector<16x32xf32>
    %38 = vector.shape_cast %37 : vector<16x32xf32> to vector<2x8x4x8xf32>
    %39 = tpu.transpose %38, [0, 2, 1, 3] : vector<2x8x4x8xf32> -> vector<2x4x8x8xf32>
    %40 = vector.shape_cast %39 : vector<2x4x8x8xf32> to vector<8x8x8xf32>
    %41 = arith.truncf %40 : vector<8x8x8xf32> to vector<8x8x8xbf16>
    %c0_20 = arith.constant 0 : index
    %c0_21 = arith.constant 0 : index
    %c0_22 = arith.constant 0 : index
    %42 = vector.load %arg5[%c0_20, %c0_21, %c0_22] : memref<1x32x32xbf16, #tpu.memory_space<vmem>>, vector<1x32x32xbf16>
    %43 = vector.shape_cast %42 : vector<1x32x32xbf16> to vector<32x32xbf16>
    %cst_23 = arith.constant dense<0.000000e+00> : vector<16x32xf32>
    %44 = tpu.matmul %30, %43, %cst_23 {dimension_numbers = #tpu.dot_dimension_numbers<[1], [0], [0], [1], [0, 0, 1, 1], [], []>} : vector<16x32xbf16>, vector<32x32xbf16>, vector<16x32xf32> -> vector<16x32xf32>
    %c0_24 = arith.constant 0 : index
    %c0_25 = arith.constant 0 : index
    %c0_26 = arith.constant 0 : index
    %45 = vector.load %arg6[%c0_24, %c0_25, %c0_26] : memref<1x1x32xf32, #tpu.memory_space<vmem>>, vector<1x1x32xf32>
    %46 = vector.shape_cast %45 : vector<1x1x32xf32> to vector<1x32xf32>
    %47 = vector.broadcast %46 : vector<1x32xf32> to vector<16x32xf32>
    %48 = arith.addf %44, %47 : vector<16x32xf32>
    %49 = vector.shape_cast %48 : vector<16x32xf32> to vector<2x8x4x8xf32>
    %50 = tpu.transpose %49, [0, 2, 1, 3] : vector<2x8x4x8xf32> -> vector<2x4x8x8xf32>
    %51 = vector.shape_cast %50 : vector<2x4x8x8xf32> to vector<8x8x8xf32>
    %52 = arith.truncf %51 : vector<8x8x8xf32> to vector<8x8x8xbf16>
    %c0_27 = arith.constant 0 : index
    %c0_28 = arith.constant 0 : index
    %c0_29 = arith.constant 0 : index
    %53 = vector.load %arg7[%c0_27, %c0_28, %c0_29] : memref<1x32x32xbf16, #tpu.memory_space<vmem>>, vector<1x32x32xbf16>
    %54 = vector.shape_cast %53 : vector<1x32x32xbf16> to vector<32x32xbf16>
    %cst_30 = arith.constant dense<0.000000e+00> : vector<16x32xf32>
    %55 = tpu.matmul %30, %54, %cst_30 {dimension_numbers = #tpu.dot_dimension_numbers<[1], [0], [0], [1], [0, 0, 1, 1], [], []>} : vector<16x32xbf16>, vector<32x32xbf16>, vector<16x32xf32> -> vector<16x32xf32>
    %c0_31 = arith.constant 0 : index
    %c0_32 = arith.constant 0 : index
    %c0_33 = arith.constant 0 : index
    %56 = vector.load %arg8[%c0_31, %c0_32, %c0_33] : memref<1x1x32xf32, #tpu.memory_space<vmem>>, vector<1x1x32xf32>
    %57 = vector.shape_cast %56 : vector<1x1x32xf32> to vector<1x32xf32>
    %58 = vector.broadcast %57 : vector<1x32xf32> to vector<16x32xf32>
    %59 = arith.addf %55, %58 : vector<16x32xf32>
    %60 = vector.shape_cast %59 : vector<16x32xf32> to vector<2x8x4x8xf32>
    %61 = tpu.transpose %60, [0, 2, 1, 3] : vector<2x8x4x8xf32> -> vector<2x4x8x8xf32>
    %62 = vector.shape_cast %61 : vector<2x4x8x8xf32> to vector<8x8x8xf32>
    %63 = arith.truncf %62 : vector<8x8x8xf32> to vector<8x8x8xbf16>
    "tpu.trace_start"() <{level = 10 : i32, message = "nqd,nkd->nqk"}> : () -> ()
    %cst_34 = arith.constant dense<0.000000e+00> : vector<8x8x8xf32>
    %64 = tpu.matmul %41, %52, %cst_34 {dimension_numbers = #tpu.dot_dimension_numbers<[2], [2], [1], [1], [0, 0, 0, 1, 1, 1], [0], [0]>} : vector<8x8x8xbf16>, vector<8x8x8xbf16>, vector<8x8x8xf32> -> vector<8x8x8xf32>
    "tpu.trace_stop"() : () -> ()
    %cst_35 = arith.constant 0.353553385 : f32
    %65 = vector.broadcast %cst_35 : f32 to vector<8x8x8xf32>
    %66 = arith.mulf %64, %65 : vector<8x8x8xf32>
    %cst_36 = arith.constant dense<0xFF800000> : vector<8x8xf32>
    %67 = vector.multi_reduction <maximumf>, %66, %cst_36 [2] : vector<8x8x8xf32> to vector<8x8xf32>
    %68 = vector.shape_cast %67 : vector<8x8xf32> to vector<8x8x1xf32>
    %69 = vector.broadcast %68 : vector<8x8x1xf32> to vector<8x8x8xf32>
    %70 = arith.subf %66, %69 : vector<8x8x8xf32>
    %71 = math.exp %70 : vector<8x8x8xf32>
    %cst_37 = arith.constant dense<0.000000e+00> : vector<8x8xf32>
    %72 = vector.multi_reduction <add>, %71, %cst_37 [2] : vector<8x8x8xf32> to vector<8x8xf32>
    %73 = vector.shape_cast %72 : vector<8x8xf32> to vector<8x8x1xf32>
    %74 = tpu.reciprocal %73 {approx = true} : vector<8x8x1xf32> -> vector<8x8x1xf32>
    %75 = vector.broadcast %74 : vector<8x8x1xf32> to vector<8x8x8xf32>
    %76 = arith.mulf %71, %75 : vector<8x8x8xf32>
    %77 = arith.truncf %76 : vector<8x8x8xf32> to vector<8x8x8xbf16>
    "tpu.trace_start"() <{level = 10 : i32, message = "nqk,nkd->nqd"}> : () -> ()
    %cst_38 = arith.constant dense<0.000000e+00> : vector<8x8x8xf32>
    %78 = tpu.matmul %77, %63, %cst_38 {dimension_numbers = #tpu.dot_dimension_numbers<[2], [1], [1], [2], [0, 0, 0, 1, 1, 2], [0], [0]>} : vector<8x8x8xbf16>, vector<8x8x8xbf16>, vector<8x8x8xf32> -> vector<8x8x8xf32>
    "tpu.trace_stop"() : () -> ()
    %79 = vector.shape_cast %78 : vector<8x8x8xf32> to vector<2x4x8x8xf32>
    %80 = tpu.transpose %79, [0, 2, 1, 3] : vector<2x4x8x8xf32> -> vector<2x8x4x8xf32>
    %81 = vector.shape_cast %80 : vector<2x8x4x8xf32> to vector<16x32xf32>
    %82 = arith.truncf %81 : vector<16x32xf32> to vector<16x32xbf16>
    %c0_39 = arith.constant 0 : index
    %c0_40 = arith.constant 0 : index
    %c0_41 = arith.constant 0 : index
    %83 = vector.load %arg9[%c0_39, %c0_40, %c0_41] : memref<1x32x32xbf16, #tpu.memory_space<vmem>>, vector<1x32x32xbf16>
    %84 = vector.shape_cast %83 : vector<1x32x32xbf16> to vector<32x32xbf16>
    %cst_42 = arith.constant dense<0.000000e+00> : vector<16x32xf32>
    %85 = tpu.matmul %82, %84, %cst_42 {dimension_numbers = #tpu.dot_dimension_numbers<[1], [0], [0], [1], [0, 0, 1, 1], [], []>} : vector<16x32xbf16>, vector<32x32xbf16>, vector<16x32xf32> -> vector<16x32xf32>
    %c0_43 = arith.constant 0 : index
    %c0_44 = arith.constant 0 : index
    %c0_45 = arith.constant 0 : index
    %86 = vector.load %arg10[%c0_43, %c0_44, %c0_45] : memref<1x1x32xf32, #tpu.memory_space<vmem>>, vector<1x1x32xf32>
    %87 = vector.shape_cast %86 : vector<1x1x32xf32> to vector<1x32xf32>
    %88 = vector.broadcast %87 : vector<1x32xf32> to vector<16x32xf32>
    %89 = arith.addf %85, %88 : vector<16x32xf32>
    %90 = arith.addf %4, %89 : vector<16x32xf32>
    %c0_46 = arith.constant 0 : index
    %c0_47 = arith.constant 0 : index
    %c0_48 = arith.constant 0 : index
    %91 = vector.load %arg13[%c0_46, %c0_47, %c0_48] : memref<1x1x32xf32, #tpu.memory_space<vmem>>, vector<1x1x32xf32>
    %92 = vector.shape_cast %91 : vector<1x1x32xf32> to vector<1x32xf32>
    %c0_49 = arith.constant 0 : index
    %c0_50 = arith.constant 0 : index
    %c0_51 = arith.constant 0 : index
    %93 = vector.load %arg14[%c0_49, %c0_50, %c0_51] : memref<1x1x32xf32, #tpu.memory_space<vmem>>, vector<1x1x32xf32>
    %94 = vector.shape_cast %93 : vector<1x1x32xf32> to vector<1x32xf32>
    %cst_52 = arith.constant dense<0.000000e+00> : vector<16xf32>
    %95 = vector.multi_reduction <add>, %90, %cst_52 [1] : vector<16x32xf32> to vector<16xf32>
    %96 = vector.shape_cast %95 : vector<16xf32> to vector<16x1xf32>
    %cst_53 = arith.constant 3.200000e+01 : f32
    %97 = vector.broadcast %cst_53 : f32 to vector<16x1xf32>
    %98 = arith.divf %96, %97 : vector<16x1xf32>
    %99 = vector.broadcast %98 : vector<16x1xf32> to vector<16x32xf32>
    %100 = arith.subf %90, %99 : vector<16x32xf32>
    %101 = arith.mulf %100, %100 : vector<16x32xf32>
    %cst_54 = arith.constant dense<0.000000e+00> : vector<16xf32>
    %102 = vector.multi_reduction <add>, %101, %cst_54 [1] : vector<16x32xf32> to vector<16xf32>
    %103 = vector.shape_cast %102 : vector<16xf32> to vector<16x1xf32>
    %cst_55 = arith.constant 3.100000e+01 : f32
    %104 = vector.broadcast %cst_55 : f32 to vector<16x1xf32>
    %105 = arith.divf %103, %104 : vector<16x1xf32>
    %106 = math.sqrt %105 : vector<16x1xf32>
    %cst_56 = arith.constant 9.99999997E-7 : f32
    %107 = vector.broadcast %cst_56 : f32 to vector<16x1xf32>
    %108 = arith.addf %106, %107 : vector<16x1xf32>
    %109 = tpu.reciprocal %108 : vector<16x1xf32> -> vector<16x1xf32>
    %110 = vector.broadcast %109 : vector<16x1xf32> to vector<16x32xf32>
    %111 = arith.mulf %100, %110 : vector<16x32xf32>
    %112 = vector.broadcast %92 : vector<1x32xf32> to vector<16x32xf32>
    %113 = arith.mulf %112, %111 : vector<16x32xf32>
    %114 = vector.broadcast %94 : vector<1x32xf32> to vector<16x32xf32>
    %115 = arith.addf %113, %114 : vector<16x32xf32>
    %116 = arith.truncf %115 : vector<16x32xf32> to vector<16x32xbf16>
    %c0_57 = arith.constant 0 : index
    %c0_58 = arith.constant 0 : index
    %c0_59 = arith.constant 0 : index
    %117 = vector.load %arg15[%c0_57, %c0_58, %c0_59] : memref<1x32x64xbf16, #tpu.memory_space<vmem>>, vector<1x32x64xbf16>
    %118 = vector.shape_cast %117 : vector<1x32x64xbf16> to vector<32x64xbf16>
    %cst_60 = arith.constant dense<0.000000e+00> : vector<16x64xf32>
    %119 = tpu.matmul %116, %118, %cst_60 {dimension_numbers = #tpu.dot_dimension_numbers<[1], [0], [0], [1], [0, 0, 1, 1], [], []>} : vector<16x32xbf16>, vector<32x64xbf16>, vector<16x64xf32> -> vector<16x64xf32>
    %c0_61 = arith.constant 0 : index
    %c0_62 = arith.constant 0 : index
    %c0_63 = arith.constant 0 : index
    %120 = vector.load %arg16[%c0_61, %c0_62, %c0_63] : memref<1x1x64xf32, #tpu.memory_space<vmem>>, vector<1x1x64xf32>
    %121 = vector.shape_cast %120 : vector<1x1x64xf32> to vector<1x64xf32>
    %122 = vector.broadcast %121 : vector<1x64xf32> to vector<16x64xf32>
    %123 = arith.addf %119, %122 : vector<16x64xf32>
    %cst_64 = arith.constant 0.000000e+00 : f32
    %124 = vector.broadcast %cst_64 : f32 to vector<16x64xf32>
    %125 = arith.maximumf %123, %124 : vector<16x64xf32>
    %126 = arith.truncf %125 : vector<16x64xf32> to vector<16x64xbf16>
    %c0_65 = arith.constant 0 : index
    %c0_66 = arith.constant 0 : index
    %c0_67 = arith.constant 0 : index
    %127 = vector.load %arg17[%c0_65, %c0_66, %c0_67] : memref<1x64x32xbf16, #tpu.memory_space<vmem>>, vector<1x64x32xbf16>
    %128 = vector.shape_cast %127 : vector<1x64x32xbf16> to vector<64x32xbf16>
    %cst_68 = arith.constant dense<0.000000e+00> : vector<16x32xf32>
    %129 = tpu.matmul %126, %128, %cst_68 {dimension_numbers = #tpu.dot_dimension_numbers<[1], [0], [0], [1], [0, 0, 1, 1], [], []>} : vector<16x64xbf16>, vector<64x32xbf16>, vector<16x32xf32> -> vector<16x32xf32>
    %c0_69 = arith.constant 0 : index
    %c0_70 = arith.constant 0 : index
    %c0_71 = arith.constant 0 : index
    %130 = vector.load %arg18[%c0_69, %c0_70, %c0_71] : memref<1x1x32xf32, #tpu.memory_space<vmem>>, vector<1x1x32xf32>
    %131 = vector.shape_cast %130 : vector<1x1x32xf32> to vector<1x32xf32>
    %132 = vector.broadcast %131 : vector<1x32xf32> to vector<16x32xf32>
    %133 = arith.addf %129, %132 : vector<16x32xf32>
    %134 = arith.addf %90, %133 : vector<16x32xf32>
    %c1_i32 = arith.constant 1 : i32
    %135 = arith.cmpi slt, %arg1, %c1_i32 : i32
    %136 = arith.extui %135 : i1 to i32
    %c0_i32_72 = arith.constant 0 : i32
    %137 = arith.cmpi ne, %136, %c0_i32_72 : i32
    scf.if %137 {
      %141 = vector.shape_cast %134 : vector<16x32xf32> to vector<2x8x32xf32>
      %c0_75 = arith.constant 0 : index
      %c0_76 = arith.constant 0 : index
      %c0_77 = arith.constant 0 : index
      %142 = vector.load %arg21[%c0_75, %c0_76, %c0_77] : memref<2x8x32xf32, #tpu.memory_space<vmem>>, vector<2x8x32xf32>
      tpu.vector_store %arg21[%c0_75, %c0_76, %c0_77], %141 {strides = array<i32>} : memref<2x8x32xf32, #tpu.memory_space<vmem>>, vector<2x8x32xf32>,
    } else {
    }
    %c1_i32_73 = arith.constant 1 : i32
    %138 = arith.cmpi eq, %arg1, %c1_i32_73 : i32
    %139 = arith.extui %138 : i1 to i32
    %c0_i32_74 = arith.constant 0 : i32
    %140 = arith.cmpi ne, %139, %c0_i32_74 : i32
    scf.if %140 {
      %c0_75 = arith.constant 0 : index
      %c0_76 = arith.constant 0 : index
      %c0_77 = arith.constant 0 : index
      %141 = vector.load %arg19[%c0_75, %c0_76, %c0_77] : memref<1x1x32xf32, #tpu.memory_space<vmem>>, vector<1x1x32xf32>
      %142 = vector.shape_cast %141 : vector<1x1x32xf32> to vector<1x32xf32>
      %c0_78 = arith.constant 0 : index
      %c0_79 = arith.constant 0 : index
      %c0_80 = arith.constant 0 : index
      %143 = vector.load %arg20[%c0_78, %c0_79, %c0_80] : memref<1x1x32xf32, #tpu.memory_space<vmem>>, vector<1x1x32xf32>
      %144 = vector.shape_cast %143 : vector<1x1x32xf32> to vector<1x32xf32>
      %cst_81 = arith.constant dense<0.000000e+00> : vector<16xf32>
      %145 = vector.multi_reduction <add>, %134, %cst_81 [1] : vector<16x32xf32> to vector<16xf32>
      %146 = vector.shape_cast %145 : vector<16xf32> to vector<16x1xf32>
      %cst_82 = arith.constant 3.200000e+01 : f32
      %147 = vector.broadcast %cst_82 : f32 to vector<16x1xf32>
      %148 = arith.divf %146, %147 : vector<16x1xf32>
      %149 = vector.broadcast %148 : vector<16x1xf32> to vector<16x32xf32>
      %150 = arith.subf %134, %149 : vector<16x32xf32>
      %151 = arith.mulf %150, %150 : vector<16x32xf32>
      %cst_83 = arith.constant dense<0.000000e+00> : vector<16xf32>
      %152 = vector.multi_reduction <add>, %151, %cst_83 [1] : vector<16x32xf32> to vector<16xf32>
      %153 = vector.shape_cast %152 : vector<16xf32> to vector<16x1xf32>
      %cst_84 = arith.constant 3.100000e+01 : f32
      %154 = vector.broadcast %cst_84 : f32 to vector<16x1xf32>
      %155 = arith.divf %153, %154 : vector<16x1xf32>
      %156 = math.sqrt %155 : vector<16x1xf32>
      %cst_85 = arith.constant 9.99999997E-7 : f32
      %157 = vector.broadcast %cst_85 : f32 to vector<16x1xf32>
      %158 = arith.addf %156, %157 : vector<16x1xf32>
      %159 = tpu.reciprocal %158 : vector<16x1xf32> -> vector<16x1xf32>
      %160 = vector.broadcast %159 : vector<16x1xf32> to vector<16x32xf32>
      %161 = arith.mulf %150, %160 : vector<16x32xf32>
      %162 = vector.broadcast %142 : vector<1x32xf32> to vector<16x32xf32>
      %163 = arith.mulf %162, %161 : vector<16x32xf32>
      %164 = vector.broadcast %144 : vector<1x32xf32> to vector<16x32xf32>
      %165 = arith.addf %163, %164 : vector<16x32xf32>
      %166 = vector.shape_cast %165 : vector<16x32xf32> to vector<2x8x32xf32>
      %c0_86 = arith.constant 0 : index
      %c0_87 = arith.constant 0 : index
      %c0_88 = arith.constant 0 : index
      %167 = vector.load %arg21[%c0_86, %c0_87, %c0_88] : memref<2x8x32xf32, #tpu.memory_space<vmem>>, vector<2x8x32xf32>
      tpu.vector_store %arg21[%c0_86, %c0_87, %c0_88], %166 {strides = array<i32>} : memref<2x8x32xf32, #tpu.memory_space<vmem>>, vector<2x8x32xf32>,
    } else {
    }
    return
  }
  func.func @transform_0(%arg0: i32, %arg1: i32) -> (i32, i32, i32) {
    %c0_i32 = arith.constant 0 : i32
    %c0_i32_0 = arith.constant 0 : i32
    %c0_i32_1 = arith.constant 0 : i32
    return %arg0, %c0_i32, %c0_i32_0 : i32, i32, i32
  }
  func.func @transform_1(%arg0: i32, %arg1: i32) -> (i32, i32, i32) {
    %c0_i32 = arith.constant 0 : i32
    %c0_i32_0 = arith.constant 0 : i32
    %c0_i32_1 = arith.constant 0 : i32
    return %arg1, %c0_i32, %c0_i32_0 : i32, i32, i32
  }
  func.func @transform_2(%arg0: i32, %arg1: i32) -> (i32, i32, i32) {
    %c0_i32 = arith.constant 0 : i32
    %c0_i32_0 = arith.constant 0 : i32
    %c0_i32_1 = arith.constant 0 : i32
    return %arg1, %c0_i32, %c0_i32_0 : i32, i32, i32
  }
  func.func @transform_3(%arg0: i32, %arg1: i32) -> (i32, i32, i32) {
    %c0_i32 = arith.constant 0 : i32
    %c0_i32_0 = arith.constant 0 : i32
    %c0_i32_1 = arith.constant 0 : i32
    return %arg1, %c0_i32, %c0_i32_0 : i32, i32, i32
  }
  func.func @transform_4(%arg0: i32, %arg1: i32) -> (i32, i32, i32) {
    %c0_i32 = arith.constant 0 : i32
    %c0_i32_0 = arith.constant 0 : i32
    %c0_i32_1 = arith.constant 0 : i32
    return %arg1, %c0_i32, %c0_i32_0 : i32, i32, i32
  }
  func.func @transform_5(%arg0: i32, %arg1: i32) -> (i32, i32, i32) {
    %c0_i32 = arith.constant 0 : i32
    %c0_i32_0 = arith.constant 0 : i32
    %c0_i32_1 = arith.constant 0 : i32
    return %arg1, %c0_i32, %c0_i32_0 : i32, i32, i32
  }
  func.func @transform_6(%arg0: i32, %arg1: i32) -> (i32, i32, i32) {
    %c0_i32 = arith.constant 0 : i32
    %c0_i32_0 = arith.constant 0 : i32
    %c0_i32_1 = arith.constant 0 : i32
    return %arg1, %c0_i32, %c0_i32_0 : i32, i32, i32
  }
  func.func @transform_7(%arg0: i32, %arg1: i32) -> (i32, i32, i32) {
    %c0_i32 = arith.constant 0 : i32
    %c0_i32_0 = arith.constant 0 : i32
    %c0_i32_1 = arith.constant 0 : i32
    return %arg1, %c0_i32, %c0_i32_0 : i32, i32, i32
  }
  func.func @transform_8(%arg0: i32, %arg1: i32) -> (i32, i32, i32) {
    %c0_i32 = arith.constant 0 : i32
    %c0_i32_0 = arith.constant 0 : i32
    %c0_i32_1 = arith.constant 0 : i32
    return %arg1, %c0_i32, %c0_i32_0 : i32, i32, i32
  }
  func.func @transform_9(%arg0: i32, %arg1: i32) -> (i32, i32, i32) {
    %c0_i32 = arith.constant 0 : i32
    %c0_i32_0 = arith.constant 0 : i32
    %c0_i32_1 = arith.constant 0 : i32
    return %arg1, %c0_i32, %c0_i32_0 : i32, i32, i32
  }
  func.func @transform_10(%arg0: i32, %arg1: i32) -> (i32, i32, i32) {
    %c0_i32 = arith.constant 0 : i32
    %c0_i32_0 = arith.constant 0 : i32
    %c0_i32_1 = arith.constant 0 : i32
    return %arg1, %c0_i32, %c0_i32_0 : i32, i32, i32
  }
  func.func @transform_11(%arg0: i32, %arg1: i32) -> (i32, i32, i32) {
    %c0_i32 = arith.constant 0 : i32
    %c0_i32_0 = arith.constant 0 : i32
    %c0_i32_1 = arith.constant 0 : i32
    return %arg1, %c0_i32, %c0_i32_0 : i32, i32, i32
  }
  func.func @transform_12(%arg0: i32, %arg1: i32) -> (i32, i32, i32) {
    %c0_i32 = arith.constant 0 : i32
    %c0_i32_0 = arith.constant 0 : i32
    %c0_i32_1 = arith.constant 0 : i32
    return %arg1, %c0_i32, %c0_i32_0 : i32, i32, i32
  }
  func.func @transform_13(%arg0: i32, %arg1: i32) -> (i32, i32, i32) {
    %c0_i32 = arith.constant 0 : i32
    %c0_i32_0 = arith.constant 0 : i32
    %c0_i32_1 = arith.constant 0 : i32
    return %arg1, %c0_i32, %c0_i32_0 : i32, i32, i32
  }
  func.func @transform_14(%arg0: i32, %arg1: i32) -> (i32, i32, i32) {
    %c0_i32 = arith.constant 0 : i32
    %c0_i32_0 = arith.constant 0 : i32
    %c0_i32_1 = arith.constant 0 : i32
    return %arg1, %c0_i32, %c0_i32_0 : i32, i32, i32
  }
  func.func @transform_15(%arg0: i32, %arg1: i32) -> (i32, i32, i32) {
    %c0_i32 = arith.constant 0 : i32
    %c0_i32_0 = arith.constant 0 : i32
    %c0_i32_1 = arith.constant 0 : i32
    return %arg1, %c0_i32, %c0_i32_0 : i32, i32, i32
  }
  func.func @transform_16(%arg0: i32, %arg1: i32) -> (i32, i32, i32) {
    %c0_i32 = arith.constant 0 : i32
    %c0_i32_0 = arith.constant 0 : i32
    %c0_i32_1 = arith.constant 0 : i32
    return %arg1, %c0_i32, %c0_i32_0 : i32, i32, i32
  }
  func.func @transform_17(%arg0: i32, %arg1: i32) -> (i32, i32, i32) {
    %c0_i32 = arith.constant 0 : i32
    %c0_i32_0 = arith.constant 0 : i32
    %c0_i32_1 = arith.constant 0 : i32
    %c0_i32_2 = arith.constant 0 : i32
    return %c0_i32, %c0_i32_0, %c0_i32_1 : i32, i32, i32
  }
  func.func @transform_18(%arg0: i32, %arg1: i32) -> (i32, i32, i32) {
    %c0_i32 = arith.constant 0 : i32
    %c0_i32_0 = arith.constant 0 : i32
    %c0_i32_1 = arith.constant 0 : i32
    %c0_i32_2 = arith.constant 0 : i32
    return %c0_i32, %c0_i32_0, %c0_i32_1 : i32, i32, i32
  }
  func.func @transform_19(%arg0: i32, %arg1: i32) -> (i32, i32, i32) {
    %c0_i32 = arith.constant 0 : i32
    %c0_i32_0 = arith.constant 0 : i32
    %c0_i32_1 = arith.constant 0 : i32
    return %arg0, %c0_i32, %c0_i32_0 : i32, i32, i32
  }
}

</mosaic_0001>

<bundles_post_ra>
// kernel: tpu_custom_call.1
= control target key start
LH: loop header
LB: loop body
LE: loop exit
PB: predicated region body
PF: predicated region fallthrough
CT: control target
= control target key end

     0   :  { %s5088_s0 = inlined_call_operand.vmem [shape: f32[4,8,32], index: 0, kind: input, shape index: {}]   ;;  %s5089_s1 = inlined_call_operand.vmem [shape: bf16[2,32,32], index: 1, kind: input, shape index: {}]   ;;  %s5090_s2 = inlined_call_operand.hbm [shape: f32[2,1,32], index: 2, kind: input, shape index: {}]   ;;  %s5091_s3 = inlined_call_operand.vmem [shape: bf16[2,32,32], index: 3, kind: input, shape index: {}]   ;;  %s5092_s4 = inlined_call_operand.vmem [shape: f32[2,1,32], index: 4, kind: input, shape index: {}]   ;;  %s5093_s5 = inlined_call_operand.hbm [shape: bf16[2,32,32], index: 5, kind: input, shape index: {}]   ;;  %s5094_s6 = inlined_call_operand.vmem [shape: f32[2,1,32], index: 6, kind: input, shape index: {}]   ;;  %s5095_s7 = inlined_call_operand.hbm [shape: bf16[2,32,32], index: 7, kind: input, shape index: {}]   ;;  %s5096_s8 = inlined_call_operand.vmem [shape: f32[2,1,32], index: 8, kind: input, shape index: {}]   ;;  %s5097_s9 = inlined_call_operand.hbm [shape: f32[2,1,32], index: 9, kind: input, shape index: {}]   ;;  %s5098_s10 = inlined_call_operand.vmem [shape: f32[2,1,32], index: 10, kind: input, shape index: {}]   ;;  %s5099_s11 = inlined_call_operand.hbm [shape: f32[2,1,32], index: 11, kind: input, shape index: {}]   ;;  %s5100_s12 = inlined_call_operand.vmem [shape: f32[2,1,32], index: 12, kind: input, shape index: {}]   ;;  %s5101_s13 = inlined_call_operand.hbm [shape: bf16[2,32,64], index: 13, kind: input, shape index: {}]   ;;  %s5102_s14 = inlined_call_operand.vmem [shape: f32[2,1,64], index: 14, kind: input, shape index: {}]   ;;  %s5103_s15 = inlined_call_operand.vmem [shape: bf16[2,64,32], index: 15, kind: input, shape index: {}]   ;;  %s5104_s16 = inlined_call_operand.vmem [shape: f32[2,1,32], index: 16, kind: input, shape index: {}]   ;;  %s5105_s17 = inlined_call_operand.vmem [shape: f32[1,1,32], index: 17, kind: input, shape index: {}]   ;;  %s5106_s18 = inlined_call_operand.vmem [shape: f32[1,1,32], index: 18, kind: input, shape index: {}]   ;;  %s5107_s19 = inlined_call_operand.hbm [shape: f32[4,8,32], index: 19, kind: output, shape index: {}]  }
   0x1   :  { %5129 = sst [smem:[#allocation34_spill]] %s5088_s0 }
   0x2   :  { %5130 = sst [smem:[#allocation35_spill]] %s5089_s1 }
   0x3   :  { %5131 = sst [smem:[#allocation36_spill]] %s5090_s2 }
   0x4   :  { %5132 = sst [smem:[#allocation37_spill]] %s5091_s3 }
   0x5   :  { %5133 = sst [smem:[#allocation38_spill]] %s5092_s4 }
   0x6   :  { %5134 = sst [smem:[#allocation39_spill]] %s5093_s5 }
   0x7   :  { %5135 = sst [smem:[#allocation40_spill]] %s5094_s6 }
   0x8   :  { %5136 = sst [smem:[#allocation41_spill]] %s5095_s7 }
   0x9   :  { %5137 = sst [smem:[#allocation42_spill]] %s5096_s8 }
   0xa   :  { %5138 = sst [smem:[#allocation43_spill]] %s5097_s9 }
   0xb   :  { %5139 = sst [smem:[#allocation44_spill]] %s5098_s10 }
   0xc   :  { %5140 = sst [smem:[#allocation45_spill]] %s5099_s11 }
   0xd   :  { %5141 = sst [smem:[#allocation46_spill]] %s5100_s12 }
   0xe   :  { %5142 = sst [smem:[#allocation47_spill]] %s5101_s13 }
   0xf   :  { %5143 = sst [smem:[#allocation48_spill]] %s5102_s14 }
  0x10   :  { %5144 = sst [smem:[#allocation49_spill]] %s5103_s15 }
  0x11   :  { %5145 = sst [smem:[#allocation50_spill]] %s5104_s16 }
  0x12   :  { %5146 = sst [smem:[#allocation51_spill]] %s5105_s17 }
  0x13   :  { %5147 = sst [smem:[#allocation52_spill]] %s5106_s18 }
  0x14   :  { %5148 = sst [smem:[#allocation53_spill]] %s5107_s19 }
  0x15   :  { %24 = vsyncpa [#allocation3], 0 }
  0x16   :  { %26 = vsyncpa [#allocation3 + $0x1], 0 }
  0x17   :  { %27 = vsyncpa [#allocation6], 0 }
  0x18   :  { %29 = vsyncpa [#allocation6 + $0x1], 0 }
  0x19   :  { %30 = vsyncpa [#allocation9], 0 }
  0x1a   :  { %32 = vsyncpa [#allocation9 + $0x1], 0 }
  0x1b   :  { %33 = vsyncpa [#allocation12], 0 }
  0x1c   :  { %35 = vsyncpa [#allocation12 + $0x1], 0 }
  0x1d   :  { %36 = vsyncpa [#allocation4], 0 }
  0x1e   :  { %38 = vsyncpa [#allocation4 + $0x1], 0  ;;  %s4071_s0 = smov 0   ;;  %s4073_s30 = smov 0  }
  0x1f   :  { %s4075_s20 = smov 0   ;;  %s4077_s21 = smov 0  }
  0x20   :  { %s4079_s1 = smov 0   ;;  %s4081_s22 = smov 0  }
  0x21   :  { %s4083_s2 = smov 0   ;;  %s4085_s23 = smov 0  }
  0x22   :  { %s4087_s24 = smov 0   ;;  %s4089_s25 = smov 0  }
  0x23   :  { %s4091_s3 = smov 0  }
  0x24 LB: > { %5149 = sst [smem:[#allocation19_spill]] %s3916_s0  ;;  %s4125_s26 = sadd.s32 4294967295, %s3956_s3   ;;  %s3956_s3 = sphi %s4091_s3, %s44_s3   ;;  %s3952_s25 = sphi %s4089_s25, %s5228_s25   ;;  %s3948_s24 = sphi %s4087_s24, %s5227_s24   ;;  %s3944_s23 = sphi %s4085_s23, %s5226_s23   ;;  %s3940_s2 = sphi %s4083_s2, %s5225_s2   ;;  %s3936_s22 = sphi %s4081_s22, %s5224_s22   ;;  %s3932_s1 = sphi %s4079_s1, %s5223_s1   ;;  %s3928_s21 = sphi %s4077_s21, %s5222_s21   ;;  %s3924_s20 = sphi %s4075_s20, %s5221_s20   ;;  %s3920_s30 = sphi %s4073_s30, %s5220_s30   ;;  %s3916_s0 = sphi %s4071_s0, %s5219_s0  }
  0x25   : > { %5150 = sst [smem:[#allocation20_spill]] %s3920_s30  ;;  %s3261_s27 = sadd.s32 4294967294, %s3956_s3  }
  0x26   : > { %5151 = sst [smem:[#allocation21_spill]] %s3924_s20  ;;  %s53_s28 = sadd.s32 1, %s3948_s24 }
  0x27   : > { %5152 = sst [smem:[#allocation22_spill]] %s3932_s1  ;;  %s56_s29 = sadd.s32 1, %s3952_s25 }
  0x28   : > { %5153 = sst [smem:[#allocation23_spill]] %s3936_s22  ;;  %p54_p0 = scmp.ge.s32.totalorder %s53_s28, 2 }
  0x29   : > { %5154 = sst [smem:[#allocation24_spill]] %s3940_s2  ;;  %s115_s19 = sadd.s32 1, %s3936_s22 }
  0x2a   : > { %5155 = sst [smem:[#allocation25_spill]] %s3948_s24  ;;  %p122_p1 = scmp.ne.s32.totalorder %s3936_s22, %s3932_s1 }
  0x2b   : > { %5156 = sst [smem:[#allocation26_spill]] %s3952_s25  ;;  %p123_p2 = scmp.eq.s32.totalorder %s3956_s3, 0 }
  0x2c   : > { %5157 = sst [smem:[#allocation27_spill]] %s3956_s3  ;;  %s5230_s28 = smov (%p54_p0, %s53_s28), 0 }
  0x2d   : > { %5158 = sst [smem:[#allocation28_spill]] %s5230_s28  ;;  %s5232_s29 = smov (!%p54_p0, %s56_s29), %s3952_s25 }
  0x2e   : > { %s112_s18 = ssub.s32 %s3948_s24, %s5230_s28  ;;  %p4139_p3 = por %p123_p2, %p122_p1 }
  0x2f   : > { %p58_p4 = scmp.ge.s32.totalorder %s5232_s29, 2  ;;  %p113_p5 = scmp.eq.s32.totalorder %s112_s18, 0 }
  0x30   : > { %p128_p6 = scmp.ne.s32.totalorder %s3932_s1, %s3928_s21  ;;  %p129_p7 = scmp.eq.s32.totalorder %s4125_s26, 0 }
  0x31   : > { %s5234_s29 = smov (%p58_p4, %s5232_s29), 0  ;;  %s547_s14 = sadd.s32 1, %s3924_s20 }
  0x32   : > { %5160 = sst [smem:[#allocation29_spill]] %s5234_s29  ;;  %p4150_p8 = por %p129_p7, %p128_p6 }
  0x33   : > { %s4148_s15 = scalar_select %p113_p5, %s3936_s22, %s115_s19  }
  0x34   : > { %s544_s16 = ssub.s32 %s3952_s25, %s5234_s29  ;;  %p557_p10 = scmp.ne.s32.totalorder %s3924_s20, %s3920_s30 }
  0x35   : > { %5161 = sst [smem:[#allocation30_spill]] %s4148_s15  ;;  %p545_p9 = scmp.eq.s32.totalorder %s544_s16, 0 }
  0x36   : > { %p558_p11 = scmp.eq.s32.totalorder %s4125_s26, 3  ;;  %p563_p13 = scmp.ne.s32.totalorder %s3920_s30, %s3916_s0 }
  0x37   : > { %s4161_s18 = scalar_select %p545_p9, %s3924_s20, %s547_s14  }
  0x38   : > { %p4163_p12 = por %p558_p11, %p557_p10  ;;  %p564_p0 = scmp.eq.s32.totalorder %s3261_s27, 3 }
  0x39   : > { %5163 = sst [smem:[#allocation31_spill]] %s4161_s18  ;;  %p3430_p1 = scmp.lt.s32.totalorder %s3956_s3, 4 }
  0x3a   : > { %s5164_s21 = scalar_select %p4163_p12, 1, 0 }
  0x3b   : > { %s4171_s19 = sand.u32 1, %s3936_s22   ;;  %p4173_p2 = por %p564_p0, %p563_p13 }
  0x3c   : > { %5165 = sst [smem:[#allocation32_spill]] %s5164_s21  ;;  %s638_s16 = sand.u32 1, %s3956_s3  }
  0x3d   : > { %s5166_s15 = scalar_select %p4173_p2, 1, 0 }
  0x3e   : > { %p4180_p4 = pnand %p3430_p1, %p4139_p3  ;;  %s4185_s29 = sshll.u32 %s4171_s19, 4 }
  0x3f   : > { %5167 = sst [smem:[#allocation33_spill]] %s5166_s15  ;;  %s4188_s27 = sshll.u32 %s3948_s24, 4 }
  0x40   : > { %s5169_s5 = sld [smem:[#allocation39_spill]]  ;;  %s642_s20 = scalar_lea.vmem [#allocation5], %s4185_s29 }
  0x41   : > { %s650_s15 = sshll.u32 %s642_s20, 4  ;;  %p3273_p3 = scmp.ge.s32.totalorder %s3956_s3, 1  ;;  %s651_s15 = int_to_ptr.vmem [resolvable:$true] %s650_s15 }
  0x42   : > { %s4196_s0 = scalar_lea.sflag [#allocation6], %s638_s16  ;;  %s5118_s21 = smov 64  }
  0x43   : > { %s5120_s12 = smov 4   ;;  %p780_p5 = scmp.lt.s32.totalorder %s3956_s3, 5 }
  0x44   : > { %s5170_s9 = sld [smem:[#allocation43_spill]]  ;;  %s697_s10 = scalar_lea.vmem [#allocation8], %s4171_s19 }
  0x45   : > { %p4209_p6 = pnand %p3273_p3, %p780_p5  ;;  %s704_s8 = sshll.u32 %s697_s10, 4  ;;  %s705_s8 = int_to_ptr.vmem [resolvable:$true] %s704_s8 }
  0x46   : > { %s647_s18 = scalar_lea.hbm %s5169_s5, %s4188_s27  ;;  %s695_s6 = scalar_lea.sflag [#allocation9], %s638_s16 }
  0x47   : > { %s648_s17 = sshll.u32 %s647_s18, 4  ;;  %s5172_s22 = sld [smem:[#allocation36_spill]]  ;;  %s649_s17 = int_to_ptr.hbm [resolvable:$true] %s648_s17 }
  0x48   : > { %3413 = dma.hbm_to_vmem [thread:$0]  (!%p4180_p4), %s649_s17, 256, %s651_s15, %s4196_s0, %s5118_s21, %s5118_s21, %s5120_s12  }
  0x49   : > { %s610_s12 = scalar_lea.vmem [#allocation2], %s4171_s19  ;;  %s5173_s7 = sld [smem:[#allocation41_spill]] }
  0x4a   : > { %s700_s25 = scalar_lea.hbm %s5170_s9, %s3948_s24  ;;  %s617_s9 = sshll.u32 %s610_s12, 4  ;;  %s618_s9 = int_to_ptr.vmem [resolvable:$true] %s617_s9 }
  0x4b   : > { %s702_s5 = sshll.u32 %s700_s25, 4  ;;  %s608_s25 = scalar_lea.sflag [#allocation3], %s4171_s19  ;;  %s703_s5 = int_to_ptr.hbm [resolvable:$true] %s702_s5 }
  0x4c   : > { %3419 = dma.hbm_to_vmem [thread:$0]  (!%p4180_p4), %s703_s5, 16, %s705_s8, %s695_s6  }
  0x4d   : > { %s613_s20 = scalar_lea.hbm %s5172_s22, %s3948_s24  ;;  %s670_s15 = scalar_lea.vmem [#allocation7], %s4185_s29 }
  0x4e   : > { %s615_s21 = sshll.u32 %s613_s20, 4  ;;  %s678_s17 = sshll.u32 %s670_s15, 4  ;;  %s616_s21 = int_to_ptr.hbm [resolvable:$true] %s615_s21  ;;  %s679_s17 = int_to_ptr.vmem [resolvable:$true] %s678_s17 }
  0x4f   : > { %3410 = dma.hbm_to_vmem [thread:$0]  (!%p4180_p4), %s616_s21, 16, %s618_s9, %s608_s25  }
  0x50   : > { %s675_s5 = scalar_lea.hbm %s5173_s7, %s4188_s27  ;;  %s5174_s12 = smov 4  }
  0x51   : > { %s676_s8 = sshll.u32 %s675_s5, 4  ;;  %s5175_s22 = smov 64   ;;  %s677_s8 = int_to_ptr.hbm [resolvable:$true] %s676_s8 }
  0x52   : > { %3416 = dma.hbm_to_vmem [thread:$0]  (!%p4180_p4), %s677_s8, 256, %s679_s17, %s4196_s0, %s5175_s22, %s5175_s22, %s5174_s12  }
  0x53   : > { %s5176_s11 = sld [smem:[#allocation45_spill]]  ;;  %s720_s25 = scalar_lea.vmem [#allocation10], %s4171_s19 }
  0x54   : > { %s727_s10 = sshll.u32 %s720_s25, 4  ;;  %s5177_s13 = sld [smem:[#allocation47_spill]]  ;;  %s728_s10 = int_to_ptr.vmem [resolvable:$true] %s727_s10 }
  0x55   : > { %s744_s7 = scalar_lea.vmem [#allocation11], %s4185_s29  ;;  %s741_s0 = scalar_lea.sflag [#allocation12], %s4171_s19 }
  0x56   : > { %s752_s4 = sshll.u32 %s744_s7, 4  ;;  %s753_s4 = int_to_ptr.vmem [resolvable:$true] %s752_s4 }
  0x59   : > { %s723_s9 = scalar_lea.hbm %s5176_s11, %s3948_s24  ;;  %784 = sbr.rel (%p4209_p6) target bundleno = 2464 (0x9a0), region = 96 }
  0x5a   : > { %s725_s21 = sshll.u32 %s723_s9, 4  ;;  %s749_s15 = scalar_lea.hbm %s5177_s13, %s4188_s27  ;;  %s726_s21 = int_to_ptr.hbm [resolvable:$true] %s725_s21 }
  0x5b   : > { %3422 = dma.hbm_to_vmem [thread:$0]  (!%p4180_p4), %s726_s21, 16, %s728_s10, %s695_s6  }
  0x5c   : > { %s750_s2 = sshll.u32 %s749_s15, 4  ;;  %s4256_s6 = sand.u32 (!%p4209_p6), 1, %s3932_s1   ;;  %s751_s2 = int_to_ptr.hbm [resolvable:$true] %s750_s2 }
  0x5d   : > { %3425 = dma.hbm_to_vmem [thread:$0]  (!%p4180_p4), %s751_s2, 256, %s753_s4, %s741_s0, %s5175_s22, %s5175_s22, %s5174_s12  }
  0x5e   : > { %s787_s3 = scalar_lea.sflag [#allocation3], %s4256_s6 }
  0x5f   : > { %3895 = dma.done.wait (%p4150_p8), %s787_s3, 16  }
  0x60   : > { %3897 = vsyncadd (%p4150_p8), %s787_s3, 4294967280  ;;  %s795_s4 = sand.u32 1, %s4125_s26   ;;  %s4266_s2 = sshll.u32 %s4256_s6, 4 }
  0x61   : > { %s796_s29 = scalar_lea.sflag [#allocation6], %s795_s4 }
  0x62   : > { %3899 = dma.done.wait (%p4150_p8), %s796_s29, 512  }
  0x63   : > { %3901 = vsyncadd (%p4150_p8), %s796_s29, 4294966784  ;;  %s816_s27 = scalar_lea.sflag [#allocation9], %s795_s4 }
  0x64   : > { %3903 = dma.done.wait (%p4150_p8), %s816_s27, 32  }
  0x65   : > { %3905 = vsyncadd (%p4150_p8), %s816_s27, 4294967264  ;;  %s834_s8 = scalar_lea.sflag [#allocation12], %s4256_s6 }
  0x66   : > { %3907 = dma.done.wait (%p4150_p8), %s834_s8, 256  }
  0x67   : > { %3909 = vsyncadd (%p4150_p8), %s834_s8, 4294967040  ;;  %s5178_s12 = sld [smem:[#allocation24_spill]]  ;;  %s5125_s22 = sand.u32 1, %s3920_s30  }
  0x68   : > { %s3278_s20 = sshll.u32 %s3944_s23, 1  ;;  %s3277_s9 = sshll.u32 %s5125_s22, 4 }
  0x69   : > { %p957_p7 = scmp.lt.s32.totalorder %s3278_s20, 3  ;;  %s5179_s16 = sld [smem:[#allocation34_spill]] }
  0x6a   : > { %s5180_s4 = sld [smem:[#allocation35_spill]]  ;;  %s4342_s0 = scalar_lea.vmem [#allocation13], %s3277_s9 }
  0x6b   : > { %s5236_s20 = smov (!%p957_p7, %s3278_s20), 3  ;;  %s5181_s22 = sld [smem:[#allocation37_spill]] }
  0x6c   : > { %s3279_s28 = sshll.u32 %s5236_s20, 3  ;;  %s5187_s14 = sld [smem:[#allocation48_spill]] }
  0x6d   : > { %p962_p9 = scmp.lt.s32.totalorder %s5178_s12, 1  ;;  %s5188_s11 = sld [smem:[#allocation50_spill]] }
  0x6e   : > { %s5189_s10 = sld [smem:[#allocation49_spill]]  ;;  %p3286_p8 = scmp.ne.s32.totalorder %s5178_s12, 0 }
  0x6f   : > { %s4292_s21 = scalar_select %p962_p9, %s5178_s12, 1 }
  0x70   : > { %s960_s5 = scalar_lea.vmem %s5179_s16, %s3279_s28  ;;  %s5184_s16 = sld [smem:[#allocation42_spill]] }
  0x71   : > { %s3375_s15 = sshll.u32 %s4292_s21, 4  ;;  %s3377_s17 = sshll.u32 %s4292_s21, 5 }
  0x72   : > { %s4301_s29 = scalar_lea.vmem %s5180_s4, %s3375_s15  ;;  %s4306_s26 = scalar_lea.vmem %s5181_s22, %s3375_s15 }
  0x73   : > { %s5185_s4 = sld [smem:[#allocation44_spill]]  ;;  %s989_s7 = scalar_lea.vmem %s5187_s14, %s4292_s21 }
  0x74   : > { %s5186_s22 = sld [smem:[#allocation46_spill]]  ;;  %s997_s20 = scalar_lea.vmem %s5188_s11, %s4292_s21 }
  0x76   : > { %s980_s13 = scalar_lea.vmem %s5184_s16, %s4292_s21  ;;  %s4340_s16 = scalar_lea.vmem %s5189_s10, %s3377_s17 }
  0x77   : > { %1003 = sbr.rel (%p3286_p8) target bundleno = 127 (0x7f), region = 124 }
  0x79   : > { %s983_s24 = scalar_lea.vmem %s5185_s4, %s4292_s21 }
  0x7a   : > { %s986_s15 = scalar_lea.vmem %s5186_s22, %s4292_s21 }
  0x7c   : > { %v1004_v0 = vld [vmem:[%s960_s5] sm:$0xff]  ;;  %vm1006_vm0 = vcmask 261120   ;;  %v1005_v1 = vld [vmem:[%s960_s5 + $0x8] sm:$0xff] }
  0x7d   : > { %1007 = vst.msk [vmem:[%s4342_s0] sm:$0xff] %vm1006_vm0, %v1004_v0 }
  0x7e   : > { %1008 = vst.msk [vmem:[%s4342_s0 + $0x8] sm:$0xff] %vm1006_vm0, %v1005_v1 }
  0x7f PF: > { %vm1013_vm1 = vcmask 261120   ;;  %v3960_v6 = vmov 32.0   ;;  %v3961_v23 = vmov 31.0   ;;  %v3379_v30 = vld [vmem:[%s4301_s29 + $0x8] sm:$0xff]  ;;  %s5190_s30 = scalar_lea.vmem [#allocation5], %s4266_s2  ;;  %v3378_v34 = vld [vmem:[%s4301_s29] sm:$0xff] }
  0x80   : > { %3578 = vrcp.f32 %v3960_v6  ;;  %v3381_v31 = vld [vmem:[%s4306_s26 + $0x8] sm:$0xff]  ;;  %1144 = vmatpush.bf16.msra.mxu0 %v3379_v30  ;;  %v3380_v35 = vld [vmem:[%s4306_s26] sm:$0xff]  ;;  %s5191_s1 = smov %s5190_s30  ;;  %s5192_s18 = scalar_lea.vmem [#allocation8], %s4256_s6  ;;  %vm1173_vm0 = vcmask 1047556  }
  0x81   : > { %3580 = vrcp.f32 %v3961_v23  ;;  %v3383_v32 = vld [vmem:[%s5190_s30 + $0x8] sm:$0xff]  ;;  %1427 = vmatpush.bf16.msra.mxu1 %v3381_v31  ;;  %s5194_s5 = scalar_lea.vmem [#allocation2], %s4256_s6  ;;  %s5195_s3 = sld [smem:[#allocation38_spill]] }
  0x82   : > { %1709 = vmatpush.bf16.msra.mxu2 %v3383_v32  ;;  %v3382_v37 = vld [vmem:[%s5191_s1] sm:$0xff]  ;;  %s3963_s27 = smov 112   ;;  %s3964_s22 = smov 120  }
  0x83   : > { %v3570_v30 = vld [vmem:[%s5194_s5] ss:$0 sm:$0xff]  ;;  %s5197_s17 = sld [smem:[#allocation40_spill]]  ;;  %s3967_s11 = smov 24  }
  0x84   : > { %v1009_v2 = vld [vmem:[%s4342_s0] sm:$0xff]  ;;  %1145 = vmatpush.bf16.msra.mxu0 %v3378_v34  ;;  %s3968_s28 = smov 16   ;;  %s3969_s10 = smov 8  }
  0x85   : > { %v1014_v3 = vsel %vm1013_vm1, %v1009_v2, 0.0  ;;  %v1010_v4 = vld [vmem:[%s4342_s0 + $0x8] sm:$0xff]  ;;  %1428 = vmatpush.bf16.msra.mxu1 %v3380_v35  ;;  %s5199_s30 = scalar_lea.vmem [#allocation7], %s4266_s2 }
  0x86   : > { %1015 = vadd.xlane.f32.xlu0 %v1014_v3  ;;  %v1017_v5 = vsel %vm1013_vm1, %v1010_v4, 0.0  ;;  %v3579_v7 = vpop.eup %3578  ;;  %1710 = vmatpush.bf16.msra.mxu2 %v3382_v37  ;;  %s5200_s1 = smov %s5199_s30 }
  0x87   : > { %v1021_v8 = vmul.f32 32.0, %v3579_v7  ;;  %vm1025_vm2 = vweird.f32 %v3579_v7  ;;  %v3581_v24 = vpop.eup %3580  ;;  %s5196_s4 = scalar_lea.vmem %s5195_s3, %s4292_s21 }
  0x88   : > { %v1040_v25 = vmul.f32 31.0, %v3581_v24  ;;  %vm1044_vm3 = vweird.f32 %v3581_v24 }
  0x89   : > { %v1022_v9 = vsub.f32 1.0, %v1021_v8  ;;  %s5198_s19 = scalar_lea.vmem %s5197_s17, %s4292_s21 }
  0x8a   : > { %v1041_v26 = vsub.f32 1.0, %v1040_v25  ;;  %v3569_v25 = vld [vmem:[%s983_s24] ss:$0 sm:$0xff]  ;;  %s3962_s24 = smov 104  }
  0x8b   : > { %v1023_v10 = vmul.f32 %v3579_v7, %v1022_v9 }
  0x8c   : > { %v1042_v27 = vmul.f32 %v3581_v24, %v1041_v26 }
  0x8d   : > { %v1024_v11 = vadd.f32 %v3579_v7, %v1023_v10 }
  0x8e   : > { %1018 = vadd.xlane.f32.xlu0 %v1017_v5  ;;  %v1043_v28 = vadd.f32 %v3581_v24, %v1042_v27 }
  0x8f   : > { %v4351_v12 = vsel %vm1025_vm2, %v3579_v7, %v1024_v11  ;;  %vm1965_vm2 = vcmask 64512  }
  0x90   : > { %v4365_v29 = vsel %vm1044_vm3, %v3581_v24, %v1043_v28  ;;  %vm2225_vm3 = vcmask 1043456  }
  0xf9   : > { %v1016_v13 = vpop.xlane.xlu0 %1015 }
  0xfa   : > { %v1027_v14 = vmul.f32 %v4351_v12, %v1016_v13 }
  0xfc   : > { %v4354_v15 = vsub.f32 %v1009_v2, %v1027_v14 }
  0xfe   : > { %v1031_v16 = vmul.f32 %v4354_v15, %v4354_v15 }
 0x100   : > { %v1033_v17 = vsel %vm1013_vm1, %v1031_v16, 0.0 }
 0x101   : > { %1034 = vadd.xlane.f32.xlu1 %v1033_v17  ;;  %v1019_v18 = vpop.xlane.xlu0 %1018 }
 0x102   : > { %v1028_v19 = vmul.f32 %v4351_v12, %v1019_v18  ;;  %v3568_v18 = vld [vmem:[%s5192_s18] ss:$0 sm:$0xff] }
 0x104   : > { %v4360_v20 = vsub.f32 %v1010_v4, %v1028_v19 }
 0x106   : > { %v1032_v21 = vmul.f32 %v4360_v20, %v4360_v20 }
 0x108   : > { %v1036_v22 = vsel %vm1013_vm1, %v1032_v21, 0.0 }
 0x109   : > { %1037 = vadd.xlane.f32.xlu1 %v1036_v22 }
 0x174   : > { %v1035_v33 = vpop.xlane.xlu1 %1034 }
 0x175   : > { %v1046_v36 = vmul.f32 %v4365_v29, %v1035_v33 }
 0x177   : > { %3582 = vrsqrt.f32 %v1046_v36  ;;  %vm1055_vm4 = vcmp.eq.f32.partialorder %v1046_v36, inf  ;;  %v1058_v50 = vand.u32 2147483648, %v1046_v36  ;;  %vm1057_vm5 = vcmp.eq.f32.partialorder %v1046_v36, 0.0 }
 0x17c   : > { %v1038_v38 = vpop.xlane.xlu1 %1037 }
 0x17d   : > { %v3583_v39 = vpop.eup %3582  ;;  %v1047_v40 = vmul.f32 %v4365_v29, %v1038_v38 }
 0x17e   : > { %v1049_v41 = vmul.f32 %v3583_v39, %v1046_v36 }
 0x17f   : > { %3584 = vrsqrt.f32 %v1047_v40  ;;  %vm1067_vm6 = vcmp.eq.f32.partialorder %v1047_v40, inf  ;;  %v1070_v58 = vand.u32 2147483648, %v1047_v40  ;;  %vm1069_vm7 = vcmp.eq.f32.partialorder %v1047_v40, 0.0 }
 0x180   : > { %v1050_v42 = vmul.f32 %v3583_v39, %v1049_v41 }
 0x182   : > { %v1051_v43 = vmul.f32 0.5, %v1050_v42 }
 0x184   : > { %v1052_v44 = vsub.f32 1.5, %v1051_v43  ;;  %v3965_v43 = vmov 1983009808  }
 0x185   : > { %v3585_v45 = vpop.eup %3584 }
 0x186   : > { %v1053_v46 = vmul.f32 %v3583_v39, %v1052_v44  ;;  %v1061_v47 = vmul.f32 %v3585_v45, %v1047_v40  ;;  %v1178_v44 = vunpack.c.l.s4 %v3965_v43 }
 0x188   : > { %v1054_v48 = vmul.f32 %v1053_v46, %v1046_v36  ;;  %v1062_v49 = vmul.f32 %v3585_v45, %v1061_v47 }
 0x18a   : > { %v1056_v51 = vsel %vm1055_vm4, %v1046_v36, %v1054_v48  ;;  %v1063_v52 = vmul.f32 0.5, %v1062_v49  ;;  %v4422_v48 = vunpack.c.0.s8 %v1178_v44  ;;  %vm2621_vm4 = vcmask 130048  }
 0x18b   : > { %v1059_v53 = vsel %vm1057_vm5, %v1058_v50, %v1056_v51  ;;  %vm2624_vm5 = vcmask 195584  }
 0x18c   : > { %v1064_v54 = vsub.f32 1.5, %v1063_v52  ;;  %v1072_v55 = vadd.f32 1e-06, %v1059_v53 }
 0x18e   : > { %v1065_v56 = vmul.f32 %v3585_v45, %v1064_v54  ;;  %3586 = vrcp.f32 %v1072_v55  ;;  %v1085_v2 = vand.u32 2147483648, %v1072_v55  ;;  %vm1079_vm9 = vweird.f32 %v1072_v55 }
 0x18f   : > { %v1083_v4 = vand.u32 2147483647, %v1072_v55 }
 0x190   : > { %v1066_v57 = vmul.f32 %v1065_v56, %v1047_v40  ;;  %v1086_v8 = vor.u32 1.1754944e-38, %v1085_v2 }
 0x191   : > { %vm1084_vm11 = vcmp.eq.f32.partialorder %v1083_v4, 8.507059e+37 }
 0x192   : > { %v1068_v59 = vsel %vm1067_vm6, %v1047_v40, %v1066_v57 }
 0x193   : > { %v1071_v60 = vsel %vm1069_vm7, %v1070_v58, %v1068_v59 }
 0x194   : > { %v3587_v61 = vpop.eup %3586  ;;  %v1073_v62 = vadd.f32 1e-06, %v1071_v60 }
 0x195   : > { %v1075_v63 = vmul.f32 %v3587_v61, %v1072_v55  ;;  %vm1080_vm8 = vweird.f32 %v3587_v61  ;;  %v3966_v55 = vmov 1934713408  }
 0x196   : > { %3588 = vrcp.f32 %v1073_v62  ;;  %vm1081_vm10 = vmor %vm1079_vm9, %vm1080_vm8  ;;  %v1099_v11 = vand.u32 2147483648, %v1073_v62  ;;  %v1097_v14 = vand.u32 2147483647, %v1073_v62  ;;  %vm1093_vm13 = vweird.f32 %v1073_v62 }
 0x197   : > { %v1076_v0 = vsub.f32 1.0, %v1075_v63  ;;  %v1202_v56 = vunpack.c.l.s4 %v3966_v55 }
 0x198   : > { %v1100_v19 = vor.u32 1.1754944e-38, %v1099_v11  ;;  %vm1098_vm15 = vcmp.eq.f32.partialorder %v1097_v14, 8.507059e+37 }
 0x199   : > { %v1077_v1 = vmul.f32 %v3587_v61, %v1076_v0  ;;  %v4433_v0 = vunpack.c.0.s8 %v1202_v56 }
 0x19b   : > { %v1078_v3 = vadd.f32 %v3587_v61, %v1077_v1 }
 0x19c   : > { %v3589_v5 = vpop.eup %3588 }
 0x19d   : > { %v1082_v6 = vsel %vm1081_vm10, %v3587_v61, %v1078_v3  ;;  %v1089_v7 = vmul.f32 %v3589_v5, %v1073_v62  ;;  %vm1094_vm12 = vweird.f32 %v3589_v5 }
 0x19e   : > { %v1087_v10 = vsel %vm1084_vm11, %v1086_v8, %v1082_v6  ;;  %vm1095_vm14 = vmor %vm1093_vm13, %vm1094_vm12 }
 0x19f   : > { %v1090_v9 = vsub.f32 1.0, %v1089_v7  ;;  %v1102_v17 = vmul.f32 %v1087_v10, %v4354_v15 }
 0x1a1   : > { %v1091_v13 = vmul.f32 %v3589_v5, %v1090_v9  ;;  %v1107_v24 = vmul.f32 %v3568_v18, %v1102_v17 }
 0x1a3   : > { %v1092_v16 = vadd.f32 %v3589_v5, %v1091_v13  ;;  %v1112_v27 = vadd.f32 %v3569_v25, %v1107_v24 }
 0x1a5   : > { %v1096_v21 = vsel %vm1095_vm14, %v3589_v5, %v1092_v16 }
 0x1a6   : > { %v1101_v22 = vsel %vm1098_vm15, %v1100_v19, %v1096_v21 }
 0x1a7   : > { %v1103_v23 = vmul.f32 %v1101_v22, %v4360_v20  ;;  %v3571_v20 = vld [vmem:[%s5196_s4] ss:$0 sm:$0xff] }
 0x1a9   : > { %v1108_v26 = vmul.f32 %v3568_v18, %v1103_v23 }
 0x1ab   : > { %v1113_v15 = vadd.f32 %v3569_v25, %v1108_v26 }
 0x1ad   : > { %v1114_v28 = vpack.c.bf16 %v1113_v15, %v1112_v27 }
 0x1af   : > { %3295 = vmatmul.msk.bf16.vlgmr.msra.gmra.mxu0 %vm1013_vm1, %v1114_v28  ;;  %3304 = vmatmul.msk.bf16.vlgmr.msra.gmra.mxu1 %vm1013_vm1, %v1114_v28 }
 0x1b0   : > { %3313 = vmatmul.msk.bf16.vlgmr.msra.gmra.mxu2 %vm1013_vm1, %v1114_v28 }
 0x22c   : > { %v1147_v31 = vpop.f32.mrf.mxu0  ;;  %v1430_v32 = vpop.f32.mrf.mxu1 }
 0x22d   : > { %v4396_v33 = vadd.f32 %v3570_v30, %v1147_v31  ;;  %v1431_v34 = vadd.f32 %v3571_v20, %v1430_v32 }
 0x22f   : > { %1449 = vrot.lane.b32.xlu0 %v1431_v34, %s3962_s24  ;;  %1160 = vrot.lane.b32.xlu1 %v4396_v33, %s3963_s27  ;;  %v3533_v35 = vpack.i.bf16 %v4396_v33, %v1431_v34  ;;  %v1457_v46 = vrot.slane %v1431_v34, 4  ;;  %v1175_v63 = vrot.slane %v4396_v33, 4 }
 0x231   : > { %3534 = vrot.lane.b32.xlu2 %v3533_v35, %s3964_s22 }
 0x234   : > { %v1149_v36 = vpop.f32.mrf.mxu0  ;;  %v1432_v37 = vpop.f32.mrf.mxu1 }
 0x235   : > { %v4403_v38 = vadd.f32 %v3570_v30, %v1149_v36  ;;  %v4405_v39 = vadd.f32 %v3571_v20, %v1432_v37 }
 0x237   : > { %1451 = vrot.lane.b32.xlu0 %v4405_v39, %s3962_s24  ;;  %1162 = vrot.lane.b32.xlu1 %v4403_v38, %s3963_s27  ;;  %v1231_v3 = vrot.slane %v4403_v38, 4  ;;  %v1513_v4 = vrot.slane %v4405_v39, 4 }
 0x239   : > { %1443 = vrot.lane.b32.xlu2 %v1431_v34, %s3963_s27 }
 0x23f   : > { %1168 = vrot.lane.b32.xlu0 %v4403_v38, %s3962_s24 }
 0x241   : > { %1166 = vrot.lane.b32.xlu2 %v4396_v33, %s3962_s24 }
 0x249   : > { %1439 = vrot.lane.b32.xlu2 %v4405_v39, %s3964_s22 }
 0x251   : > { %1445 = vrot.lane.b32.xlu2 %v4405_v39, %s3963_s27 }
 0x259   : > { %1156 = vrot.lane.b32.xlu2 %v4403_v38, %s3964_s22 }
 0x28b   : > { %v3535_v40 = vpop.permute.xlu2 %3534 }
 0x28c   : > { %v3537_v42 = vunpack.i.h.bf16 %v3535_v40  ;;  %v3536_v50 = vunpack.i.l.bf16 %v3535_v40 }
 0x28e   : > { %v1187_v47 = vrot.slane %v3537_v42, 4  ;;  %v1469_v60 = vrot.slane %v3536_v50, 4 }
 0x293   : > { %v1444_v41 = vpop.permute.xlu2 %1443 }
 0x294   : > { %v1455_v45 = vrot.slane %v1444_v41, 4  ;;  %v1458_v52 = vsel %vm1173_vm0, %v1444_v41, %v1457_v46 }
 0x295   : > { %v1466_v59 = vperm.slane %v1458_v52, %v4422_v48 }
 0x296   : > { %v1456_v51 = vsel %vm1173_vm0, %v1455_v45, %v1431_v34 }
 0x297   : > { %v1462_v58 = vperm.slane %v1456_v51, %v4422_v48  ;;  %v1493_v10 = vrot.slane %v1466_v59, 4 }
 0x299   : > { %v1481_v9 = vrot.slane %v1462_v58, 4 }
 0x29b   : > { %v1167_v49 = vpop.permute.xlu2 %1166 }
 0x29c   : > { %v1185_v53 = vrot.slane %v1167_v49, 4  ;;  %v1188_v54 = vsel %vm1173_vm0, %v1167_v49, %v1187_v47 }
 0x29d   : > { %v1196_v62 = vperm.slane %v1188_v54, %v4422_v48 }
 0x29e   : > { %v1186_v57 = vsel %vm1173_vm0, %v1185_v53, %v3537_v42 }
 0x29f   : > { %v1192_v61 = vperm.slane %v1186_v57, %v4422_v48  ;;  %v1209_v17 = vrot.slane %v1196_v62, 4 }
 0x2a1   : > { %v1450_v1 = vpop.permute.xlu0 %1449  ;;  %v1161_v2 = vpop.permute.xlu1 %1160  ;;  %v1197_v16 = vrot.slane %v1192_v61, 4 }
 0x2a2   : > { %v1467_v5 = vrot.slane %v1450_v1, 4  ;;  %v1470_v6 = vsel %vm1173_vm0, %v1450_v1, %v1469_v60  ;;  %v1172_v7 = vrot.slane %v1161_v2, 4  ;;  %v1176_v8 = vsel %vm1173_vm0, %v1161_v2, %v1175_v63 }
 0x2a3   : > { %v1478_v11 = vperm.slane %v1470_v6, %v4422_v48  ;;  %v1184_v13 = vperm.slane %v1176_v8, %v4422_v48  ;;  %v1440_v14 = vpop.permute.xlu2 %1439 }
 0x2a4   : > { %v1468_v18 = vsel %vm1173_vm0, %v1467_v5, %v3536_v50  ;;  %v1174_v19 = vsel %vm1173_vm0, %v1172_v7, %v4396_v33  ;;  %v1525_v15 = vrot.slane %v1440_v14, 4 }
 0x2a5   : > { %v1474_v21 = vperm.slane %v1468_v18, %v4422_v48  ;;  %v1491_v22 = vrot.slane %v1478_v11, 4  ;;  %v1494_v23 = vsel %vm1173_vm0, %v1478_v11, %v1493_v10  ;;  %v1180_v24 = vperm.slane %v1174_v19, %v4422_v48 }
 0x2a6   : > { %v1502_v25 = vperm.slane %v1494_v23, %v4433_v0  ;;  %v1210_v26 = vsel %vm1173_vm0, %v1209_v17, %v1184_v13  ;;  %v1211_v27 = vrot.slane %v1184_v13, 4 }
 0x2a7   : > { %v1479_v28 = vrot.slane %v1474_v21, 4  ;;  %v1482_v30 = vsel %vm1173_vm0, %v1474_v21, %v1481_v9  ;;  %v1492_v20 = vsel %vm1173_vm0, %v1491_v22, %v1466_v59  ;;  %v1198_v31 = vsel %vm1173_vm0, %v1197_v16, %v1180_v24 }
 0x2a8   : > { %v1490_v32 = vperm.slane %v1482_v30, %v4433_v0  ;;  %v1498_v33 = vperm.slane %v1492_v20, %v4433_v0  ;;  %v1509_v34 = vrot.slane %v1502_v25, 4  ;;  %v1199_v35 = vrot.slane %v1180_v24, 4 }
 0x2a9   : > { %v1480_v36 = vsel %vm1173_vm0, %v1479_v28, %v1462_v58  ;;  %v1204_v37 = vperm.slane %v1198_v31, %v4433_v0  ;;  %v1212_v40 = vsel %vm1173_vm0, %v1196_v62, %v1211_v27  ;;  %v1216_v41 = vperm.slane %v1210_v26, %v4433_v0  ;;  %v1452_v42 = vpop.permute.xlu0 %1451  ;;  %v1163_v57 = vpop.permute.xlu1 %1162 }
 0x2aa   : > { %v1486_v43 = vperm.slane %v1480_v36, %v4433_v0  ;;  %v1505_v44 = vrot.slane %v1490_v32, 4  ;;  %v1507_v45 = vrot.slane %v1498_v33, 4  ;;  %v1510_v46 = vsel %vm1173_vm0, 0.0, %v1509_v34 }
 0x2ab   : > { %v1578_v47 = vsel %vm1173_vm0, %v1509_v34, %v1498_v33  ;;  %v1583_v49 = vrot.slane %v1510_v46, 4  ;;  %v1200_v50 = vsel %vm1173_vm0, %v1192_v61, %v1199_v35  ;;  %v1220_v51 = vperm.slane %v1212_v40, %v4433_v0  ;;  %v1446_v52 = vpop.permute.xlu2 %1445 }
 0x2ac   : > { %v1503_v53 = vrot.slane %v1486_v43, 4  ;;  %v1506_v54 = vsel %vm1173_vm0, 0.0, %v1505_v44  ;;  %v1508_v55 = vsel %vm1173_vm0, 0.0, %v1507_v45  ;;  %v4466_v56 = vperm.slane %v1578_v47, %v4422_v48 }
 0x2ad   : > { %v1572_v58 = vrot.slane %v1506_v54, 4  ;;  %v4469_v59 = vsel %vm1173_vm0, %v1583_v49, %v1508_v55  ;;  %v1208_v60 = vperm.slane %v1200_v50, %v4433_v0  ;;  %v1221_v62 = vrot.slane %v1204_v37, 4 }
 0x2ae   : > { %v1225_v61 = vrot.slane %v1216_v41, 4  ;;  %v1227_v63 = vrot.slane %v1220_v51, 4  ;;  %v1523_v1 = vrot.slane %v1452_v42, 4  ;;  %v1526_v2 = vsel %vm1173_vm0, %v1452_v42, %v1525_v15 }
 0x2af   : > { %v4474_v5 = vsel %vm1173_vm0, 0.0, %v1221_v62  ;;  %v1223_v6 = vrot.slane %v1208_v60, 4  ;;  %v1534_v7 = vperm.slane %v1526_v2, %v4422_v48  ;;  %v1229_v8 = vrot.slane %v1163_v57, 4 }
 0x2b0   : > { %v1226_v9 = vsel %vm1173_vm0, 0.0, %v1225_v61  ;;  %v1228_v10 = vsel %vm1173_vm0, 0.0, %v1227_v63  ;;  %v1296_v11 = vsel %vm1173_vm0, %v1227_v63, %v1216_v41  ;;  %v1524_v13 = vsel %vm1173_vm0, %v1523_v1, %v1440_v14 }
 0x2b1   : > { %v4482_v16 = vsel %vm1173_vm0, 0.0, %v1223_v6  ;;  %v1285_v17 = vsel %vm1173_vm0, %v1223_v6, %v1204_v37  ;;  %v4486_v18 = vperm.slane %v1296_v11, %v4422_v48  ;;  %v1301_v19 = vrot.slane %v1228_v10, 4  ;;  %v1169_v25 = vpop.permute.xlu0 %1168 }
 0x2b2   : > { %v4489_v21 = vperm.slane %v1285_v17, %v4422_v48  ;;  %v1290_v22 = vrot.slane %v4482_v16, 4  ;;  %v1530_v23 = vperm.slane %v1524_v13, %v4422_v48  ;;  %v1547_v24 = vrot.slane %v1534_v7, 4 }
 0x2b3   : > { %v1302_v14 = vsel %vm1173_vm0, %v1301_v19, %v1226_v9  ;;  %v1321_v26 = vrot.slane %v4486_v18, 4  ;;  %v1230_v27 = vsel %vm1173_vm0, %v1229_v8, %v4403_v38  ;;  %v1232_v15 = vsel %vm1173_vm0, %v1163_v57, %v1231_v3  ;;  %v1157_v28 = vpop.permute.xlu2 %1156 }
 0x2b4   : > { %v4501_v30 = vperm.slane %v1302_v14, %v4422_v48  ;;  %v1535_v20 = vrot.slane %v1530_v23, 4  ;;  %v1236_v31 = vperm.slane %v1230_v27, %v4422_v48  ;;  %v1240_v32 = vperm.slane %v1232_v15, %v4422_v48 }
 0x2b5   : > { %v1511_v33 = vrot.slane %v1446_v52, 4  ;;  %v1514_v34 = vsel %vm1173_vm0, %v1446_v52, %v1513_v4  ;;  %v1241_v35 = vrot.slane %v1169_v25, 4  ;;  %v1243_v36 = vrot.slane %v1157_v28, 4 }
 0x2b6   : > { %v1255_v37 = vrot.slane %v1236_v31, 4  ;;  %v1267_v38 = vrot.slane %v1240_v32, 4  ;;  %v1522_v3 = vperm.slane %v1514_v34, %v4422_v48  ;;  %v1504_v40 = vsel %vm1173_vm0, 0.0, %v1503_v53 }
 0x2b7   : > { %v1512_v41 = vsel %vm1173_vm0, %v1511_v33, %v4405_v39  ;;  %v1242_v42 = vsel %vm1173_vm0, %v1241_v35, %v1157_v28  ;;  %v1244_v45 = vsel %vm1173_vm0, %v1169_v25, %v1243_v36  ;;  %v1567_v46 = vsel %vm1173_vm0, %v1505_v44, %v1486_v43 }
 0x2b8   : > { %v1518_v47 = vperm.slane %v1512_v41, %v4422_v48  ;;  %v1548_v4 = vsel %vm1173_vm0, %v1547_v24, %v1522_v3  ;;  %v1549_v49 = vrot.slane %v1522_v3, 4  ;;  %v1248_v50 = vperm.slane %v1242_v42, %v4422_v48 }
 0x2b9   : > { %v1554_v51 = vperm.slane %v1548_v4, %v4433_v0  ;;  %v1252_v52 = vperm.slane %v1244_v45, %v4422_v48  ;;  %v4521_v53 = vperm.slane %v1567_v46, %v4422_v48  ;;  %v1573_v39 = vsel %vm1173_vm0, %v1572_v58, %v1504_v40 }
 0x2ba   : > { %v1536_v54 = vsel %vm1173_vm0, %v1535_v20, %v1518_v47  ;;  %v1537_v55 = vrot.slane %v1518_v47, 4  ;;  %v1550_v43 = vsel %vm1173_vm0, %v1534_v7, %v1549_v49  ;;  %v1253_v44 = vrot.slane %v1248_v50, 4 }
 0x2bb   : > { %v1542_v57 = vperm.slane %v1536_v54, %v4433_v0  ;;  %v1558_v60 = vperm.slane %v1550_v43, %v4433_v0  ;;  %v1563_v62 = vrot.slane %v1554_v51, 4  ;;  %v1256_v61 = vsel %vm1173_vm0, %v1248_v50, %v1255_v37 }
 0x2bc   : > { %v1538_v63 = vsel %vm1173_vm0, %v1530_v23, %v1537_v55  ;;  %v1254_v1 = vsel %vm1173_vm0, %v1253_v44, %v1236_v31  ;;  %v1264_v2 = vperm.slane %v1256_v61, %v4433_v0  ;;  %v1265_v58 = vrot.slane %v1252_v52, 4 }
 0x2bd   : > { %v1546_v6 = vperm.slane %v1538_v63, %v4433_v0  ;;  %v1559_v8 = vrot.slane %v1542_v57, 4  ;;  %v1564_v7 = vsel %vm1173_vm0, 0.0, %v1563_v62  ;;  %v1565_v9 = vrot.slane %v1558_v60, 4 }
 0x2be   : > { %v1260_v10 = vperm.slane %v1254_v1, %v4433_v0  ;;  %v1266_v11 = vsel %vm1173_vm0, %v1265_v58, %v1240_v32  ;;  %v1268_v13 = vsel %vm1173_vm0, %v1252_v52, %v1267_v38  ;;  %v1279_v17 = vrot.slane %v1264_v2, 4 }
 0x2bf   : > { %v4538_v19 = vsel %vm1173_vm0, 0.0, %v1559_v8  ;;  %v1561_v23 = vrot.slane %v1546_v6, 4  ;;  %v1566_v24 = vsel %vm1173_vm0, 0.0, %v1565_v9  ;;  %v1632_v25 = vsel %vm1173_vm0, %v1565_v9, %v1554_v51 }
 0x2c0   : > { %v4543_v14 = vperm.slane %v1632_v25, %v4422_v48  ;;  %v1637_v27 = vrot.slane %v1566_v24, 4  ;;  %v1272_v15 = vperm.slane %v1266_v11, %v4433_v0  ;;  %v1276_v28 = vperm.slane %v1268_v13, %v4433_v0 }
 0x2c1   : > { %v4548_v20 = vsel %vm1173_vm0, 0.0, %v1561_v23  ;;  %v4551_v31 = vsel %vm1173_vm0, %v1561_v23, %v1542_v57  ;;  %v1277_v32 = vrot.slane %v1260_v10, 4  ;;  %v1280_v33 = vsel %vm1173_vm0, 0.0, %v1279_v17 }
 0x2c2   : > { %v1626_v34 = vrot.slane %v4548_v20, 4  ;;  %v1638_v35 = vsel %vm1173_vm0, %v1637_v27, %v1564_v7  ;;  %v1657_v36 = vrot.slane %v4543_v14, 4  ;;  %v1281_v37 = vrot.slane %v1272_v15, 4 }
 0x2c3   : > { %v4558_v38 = vperm.slane %v1638_v35, %v4422_v48  ;;  %v1278_v3 = vsel %vm1173_vm0, 0.0, %v1277_v32  ;;  %v1283_v40 = vrot.slane %v1276_v28, 4  ;;  %v1339_v41 = vsel %vm1173_vm0, %v1279_v17, %v1260_v10 }
 0x2c4   : > { %v1282_v42 = vsel %vm1173_vm0, 0.0, %v1281_v37  ;;  %v4564_v45 = vperm.slane %v1339_v41, %v4422_v48  ;;  %v1344_v46 = vrot.slane %v1280_v33, 4  ;;  %v1577_v47 = vperm.slane %v1573_v39, %v4422_v48 }
 0x2c5   : > { %v1284_v4 = vsel %vm1173_vm0, 0.0, %v1283_v40  ;;  %v1350_v49 = vsel %vm1173_vm0, %v1283_v40, %v1272_v15  ;;  %v1588_v50 = vperm.slane %v4469_v59, %v4422_v48  ;;  %v1591_v51 = vrot.slane %v4521_v53, 4 }
 0x2c6   : > { %v1345_v52 = vsel %vm1173_vm0, %v1344_v46, %v1278_v3  ;;  %v4574_v54 = vperm.slane %v1350_v49, %v4422_v48  ;;  %v1355_v55 = vrot.slane %v1284_v4, 4  ;;  %v1363_v43 = vrot.slane %v4564_v45, 4 }
 0x2c7   : > { %v4578_v44 = vperm.slane %v1345_v52, %v4422_v48  ;;  %v1592_v39 = vsel %vm1173_vm0, %v1577_v47, %v1591_v51  ;;  %v1603_v57 = vrot.slane %v4466_v56, 4  ;;  %v1589_v61 = vrot.slane %v1577_v47, 4 }
 0x2c8   : > { %v1356_v59 = vsel %vm1173_vm0, %v1355_v55, %v1282_v42  ;;  %v1375_v60 = vrot.slane %v4574_v54, 4  ;;  %v1600_v62 = vperm.slane %v1592_v39, %v4433_v0  ;;  %v1601_v2 = vrot.slane %v1588_v50, 4 }
 0x2c9   : > { %v4586_v63 = vperm.slane %v1356_v59, %v4422_v48  ;;  %v1604_v1 = vsel %vm1173_vm0, %v1588_v50, %v1603_v57  ;;  %v1291_v58 = vsel %vm1173_vm0, %v1290_v22, %v4474_v5  ;;  %v1590_v8 = vsel %vm1173_vm0, %v1589_v61, %v4521_v53 }
 0x2ca   : > { %v1612_v6 = vperm.slane %v1604_v1, %v4433_v0  ;;  %v1619_v7 = vrot.slane %v1600_v62, 4  ;;  %v1295_v9 = vperm.slane %v1291_v58, %v4422_v48  ;;  %v1596_v10 = vperm.slane %v1590_v8, %v4433_v0 }
 0x2cb   : > { %v1602_v11 = vsel %vm1173_vm0, %v1601_v2, %v4466_v56  ;;  %v1309_v13 = vrot.slane %v4489_v21, 4  ;;  %v1322_v5 = vsel %vm1173_vm0, %v4501_v30, %v1321_v26  ;;  %v1319_v49 = vrot.slane %v4501_v30, 4 }
 0x2cc   : > { %v1617_v16 = vrot.slane %v1612_v6, 4  ;;  %v1608_v22 = vperm.slane %v1602_v11, %v4433_v0  ;;  %v1620_v53 = vsel %vm1173_vm0, %v1612_v6, %v1619_v7  ;;  %v1330_v17 = vperm.slane %v1322_v5, %v4433_v0 }
 0x2cd   : > { %v1678_v23 = vpack.c.bf16 %v1620_v53, %v1620_v53  ;;  %v1615_v24 = vrot.slane %v1596_v10, 4  ;;  %v1310_v25 = vsel %vm1173_vm0, %v1295_v9, %v1309_v13  ;;  %v1307_v27 = vrot.slane %v1295_v9, 4 }
 0x2ce   : > { %v1618_v56 = vsel %vm1173_vm0, %v1617_v16, %v1600_v62  ;;  %v1613_v15 = vrot.slane %v1608_v22, 4  ;;  %v1318_v28 = vperm.slane %v1310_v25, %v4433_v0  ;;  %v1335_v32 = vrot.slane %v1330_v17, 4 }
 0x2cf   : > { %v1677_v33 = vpack.c.bf16 %v1618_v56, %v1618_v56  ;;  %v2027_v26 = vsel %vm1965_vm2, %v1678_v23, 0  ;;  %v1616_v35 = vsel %vm1173_vm0, %v1608_v22, %v1615_v24  ;;  %v1308_v37 = vsel %vm1173_vm0, %v1307_v27, %v4489_v21 }
 0x2d0   : > { %v1614_v3 = vsel %vm1173_vm0, %v1613_v15, %v1596_v10  ;;  %2036 = vmatpush.bf16.xpose.msrb.mxu2 %v2027_v26  ;;  %v1676_v40 = vpack.c.bf16 %v1616_v35, %v1616_v35  ;;  %v1336_v41 = vsel %vm1173_vm0, %v1335_v32, %v1318_v28  ;;  %v1314_v42 = vperm.slane %v1308_v37, %v4433_v0 }
 0x2d1   : > { %v2008_v46 = vsel %vm1965_vm2, %v1677_v33, 0  ;;  %v1675_v47 = vpack.c.bf16 %v1614_v3, %v1614_v3  ;;  %v1395_v4 = vpack.c.bf16 %v1336_v41, %v1336_v41  ;;  %v1337_v52 = vrot.slane %v1318_v28, 4 }
 0x2d2   : > { %2017 = vmatpush.bf16.xpose.msrb.mxu1 %v2008_v46  ;;  %v1989_v50 = vsel %vm1965_vm2, %v1676_v40, 0  ;;  %v1333_v51 = vrot.slane %v1314_v42, 4  ;;  %v1625_v21 = vperm.slane %v4551_v31, %v4422_v48  ;;  %v1320_v39 = vsel %vm1173_vm0, %v1319_v49, %v4486_v18 }
 0x2d3   : > { %v1970_v55 = vsel %vm1965_vm2, %v1675_v47, 0  ;;  %1998 = vmatpush.bf16.xpose.msrb.mxu0 %v1989_v50  ;;  %v1627_v57 = vsel %vm1173_vm0, %v1626_v34, %v4538_v19  ;;  %v1658_v30 = vsel %vm1173_vm0, %v4558_v38, %v1657_v36  ;;  %v1326_v59 = vperm.slane %v1320_v39, %v4433_v0  ;;  %v1712_v39 = vpop.f32.mrf.mxu2 }
 0x2d4   : > { %1979 = vmatpush.bf16.xpose.msra.mxu3 %v1970_v55  ;;  %v1338_v31 = vsel %vm1173_vm0, %v1330_v17, %v1337_v52  ;;  %v1631_v62 = vperm.slane %v1627_v57, %v4422_v48  ;;  %v1645_v61 = vrot.slane %v1625_v21, 4  ;;  %v1666_v18 = vperm.slane %v1658_v30, %v4433_v0 }
 0x2d5   : > { %v1396_v1 = vpack.c.bf16 %v1338_v31, %v1338_v31  ;;  %v1655_v20 = vrot.slane %v4558_v38, 4  ;;  %v1364_v19 = vsel %vm1173_vm0, %v4578_v44, %v1363_v43  ;;  %v1331_v34 = vrot.slane %v1326_v59, 4 }
 0x2d6   : > { %v1334_v36 = vsel %vm1173_vm0, %v1326_v59, %v1333_v51  ;;  %v1646_v2 = vsel %vm1173_vm0, %v1631_v62, %v1645_v61  ;;  %v1643_v58 = vrot.slane %v1631_v62, 4  ;;  %v1671_v7 = vrot.slane %v1666_v18, 4 }
 0x2d7   : > { %3317 = vmatmul.msk.bf16.vlgmr.msrb.gmra.mxu2 %vm1965_vm2, %v1396_v1  ;;  %v1394_v6 = vpack.c.bf16 %v1334_v36, %v1334_v36  ;;  %v1654_v8 = vperm.slane %v1646_v2, %v4433_v0  ;;  %v1656_v38 = vsel %vm1173_vm0, %v1655_v20, %v4543_v14  ;;  %v1332_v9 = vsel %vm1173_vm0, %v1331_v34, %v1314_v42 }
 0x2d8   : > { %v1644_v10 = vsel %vm1173_vm0, %v1643_v58, %v1625_v21  ;;  %v1662_v43 = vperm.slane %v1656_v38, %v4433_v0  ;;  %v1372_v11 = vperm.slane %v1364_v19, %v4433_v0  ;;  %v1393_v13 = vpack.c.bf16 %v1332_v9, %v1332_v9 }
 0x2d9   : > { %3316 = vmatmul.msk.bf16.vlgmr.msrb.gmra.mxu1 %vm1965_vm2, %v1395_v4  ;;  %v1672_v5 = vsel %vm1173_vm0, %v1671_v7, %v1654_v8  ;;  %v1650_v16 = vperm.slane %v1644_v10, %v4433_v0  ;;  %v1673_v22 = vrot.slane %v1654_v8, 4  ;;  %v1376_v17 = vsel %vm1173_vm0, %v4586_v63, %v1375_v60 }
 0x2da   : > { %3315 = vmatmul.msk.bf16.vlgmr.msrb.gmra.mxu0 %vm1965_vm2, %v1394_v6  ;;  %v1681_v53 = vpack.c.bf16 %v1672_v5, %v1672_v5  ;;  %v1667_v14 = vrot.slane %v1662_v43, 4  ;;  %v1361_v23 = vrot.slane %v4578_v44, 4  ;;  %v1384_v27 = vperm.slane %v1376_v17, %v4433_v0 }
 0x2db   : > { %3314 = vmatmul.msk.bf16.vlgmr.msra.gmra.mxu3 %vm1965_vm2, %v1393_v13  ;;  %v1669_v24 = vrot.slane %v1650_v16, 4  ;;  %v1674_v25 = vsel %vm1173_vm0, %v1666_v18, %v1673_v22  ;;  %v1373_v56 = vrot.slane %v4586_v63, 4  ;;  %v1391_v3 = vrot.slane %v1372_v11, 4  ;;  %v1714_v57 = vpop.f32.mrf.mxu2 }
 0x2dc   : > { %v2084_v15 = vsel %vm1965_vm2, %v1681_v53, 0  ;;  %v1668_v28 = vsel %vm1173_vm0, %v1667_v14, %v1650_v16  ;;  %v1682_v32 = vpack.c.bf16 %v1674_v25, %v1674_v25  ;;  %v1362_v33 = vsel %vm1173_vm0, %v1361_v23, %v4564_v45 }
 0x2dd   : > { %2093 = vmatpush.bf16.xpose.msra.mxu1 %v2084_v15  ;;  %v1679_v60 = vpack.c.bf16 %v1668_v28, %v1668_v28  ;;  %v1670_v44 = vsel %vm1173_vm0, %v1662_v43, %v1669_v24  ;;  %v1368_v26 = vperm.slane %v1362_v33, %v4433_v0  ;;  %v1374_v63 = vsel %vm1173_vm0, %v1373_v56, %v4574_v54  ;;  %v3572_v56 = vld [vmem:[%s5198_s19] ss:$0 sm:$0xff] }
 0x2de   : > { %v2103_v35 = vsel %vm1965_vm2, %v1682_v32, 0  ;;  %v1680_v37 = vpack.c.bf16 %v1670_v44, %v1670_v44  ;;  %v1380_v41 = vperm.slane %v1374_v63, %v4433_v0  ;;  %v1389_v42 = vrot.slane %v1384_v27, 4 }
 0x2df   : > { %v2046_v40 = vsel %vm1965_vm2, %v1679_v60, 0  ;;  %2112 = vmatpush.bf16.xpose.msra.mxu2 %v2103_v35  ;;  %v1387_v46 = vrot.slane %v1368_v26, 4  ;;  %v1392_v4 = vsel %vm1173_vm0, %v1384_v27, %v1391_v3  ;;  %v4702_v15 = vadd.f32 %v3572_v56, %v1714_v57 }
 0x2e0   : > { %2055 = vmatpush.bf16.xpose.msrb.mxu3 %v2046_v40  ;;  %v2065_v45 = vsel %vm1965_vm2, %v1680_v37, 0  ;;  %v1385_v47 = vrot.slane %v1380_v41, 4  ;;  %v1390_v49 = vsel %vm1173_vm0, %v1389_v42, %v1372_v11  ;;  %v1400_v50 = vpack.c.bf16 %v1392_v4, %v1392_v4 }
 0x2e1   : > { %2074 = vmatpush.bf16.xpose.msra.mxu0 %v2065_v45  ;;  %v1388_v54 = vsel %vm1173_vm0, %v1380_v41, %v1387_v46  ;;  %v1399_v52 = vpack.c.bf16 %v1390_v49, %v1390_v49  ;;  %v4704_v28 = vadd.f32 %v3572_v56, %v1712_v39 }
 0x2e2   : > { %v1386_v51 = vsel %vm1173_vm0, %v1385_v47, %v1368_v26  ;;  %v1398_v21 = vpack.c.bf16 %v1388_v54, %v1388_v54 }
 0x2e3   : > { %v1397_v55 = vpack.c.bf16 %v1386_v51, %v1386_v51  ;;  %v3538_v32 = vpack.i.bf16 %v4702_v15, %v4704_v28 }
 0x2e7   : > { %3321 = vmatmul.msk.bf16.vlgmr.msra.gmra.mxu2 %vm1965_vm2, %v1400_v50 }
 0x2e9   : > { %3320 = vmatmul.msk.bf16.vlgmr.msra.gmra.mxu1 %vm1965_vm2, %v1399_v52 }
 0x2ea   : > { %3319 = vmatmul.msk.bf16.vlgmr.msra.gmra.mxu0 %vm1965_vm2, %v1398_v21 }
 0x2eb   : > { %3318 = vmatmul.msk.bf16.vlgmr.msrb.gmra.mxu3 %vm1965_vm2, %v1397_v55 }
 0x356   : > { %v2019_v30 = vpop.f32.mrf.mxu1 }
 0x357   : > { %v2120_v59 = vmul.f32 0.35355338, %v2019_v30  ;;  %v2000_v31 = vpop.f32.mrf.mxu0 }
 0x358   : > { %v2119_v62 = vmul.f32 0.35355338, %v2000_v31 }
 0x359   : > { %v2132_v61 = vsel %vm1965_vm2, %v2120_v59, -inf }
 0x35a   : > { %2133 = vmax.xlane.f32.xlu0 %v2132_v61  ;;  %v2038_v1 = vpop.f32.mrf.mxu2  ;;  %v2129_v18 = vsel %vm1965_vm2, %v2119_v62, -inf }
 0x35b   : > { %v2121_v20 = vmul.f32 0.35355338, %v2038_v1  ;;  %2130 = vmax.xlane.f32.xlu2 %v2129_v18 }
 0x35d   : > { %v2135_v19 = vsel %vm1965_vm2, %v2121_v20, -inf }
 0x35e   : > { %v2021_v34 = vpop.f32.mrf.mxu1  ;;  %v1981_v36 = vpop.f32.mrf.mxu3  ;;  %2136 = vmax.xlane.f32.xlu1 %v2135_v19 }
 0x35f   : > { %v2118_v2 = vmul.f32 0.35355338, %v1981_v36  ;;  %v2002_v58 = vpop.f32.mrf.mxu0 }
 0x361   : > { %v2126_v8 = vsel %vm1965_vm2, %v2118_v2, -inf }
 0x362   : > { %v2040_v6 = vpop.f32.mrf.mxu2 }
 0x363   : > { %2127 = vmax.xlane.f32.xlu2 %v2126_v8 }
 0x366   : > { %v2095_v7 = vpop.f32.mrf.mxu1  ;;  %v1983_v38 = vpop.f32.mrf.mxu3 }
 0x367   : > { %v2124_v9 = vmul.f32 0.35355338, %v2095_v7  ;;  %v2076_v10 = vpop.f32.mrf.mxu0 }
 0x368   : > { %v4690_v43 = vmul.f32 0.35355338, %v2076_v10  ;;  %v1795_v10 = vrot.slane %v4702_v15, 4 }
 0x369   : > { %v2144_v5 = vsel %vm1965_vm2, %v2124_v9, -inf }
 0x36a   : > { %v2114_v11 = vpop.f32.mrf.mxu2  ;;  %v2141_v13 = vsel %vm1965_vm2, %v4690_v43, -inf }
 0x36b   : > { %v2125_v16 = vmul.f32 0.35355338, %v2114_v11  ;;  %2142 = vmax.xlane.f32.xlu1 %v2141_v13  ;;  %2145 = vmax.xlane.f32.xlu2 %v2144_v5  ;;  %v1739_v13 = vrot.slane %v4704_v28, 4 }
 0x36d   : > { %v2147_v22 = vsel %vm1965_vm2, %v2125_v16, -inf }
 0x36e   : > { %v2097_v53 = vpop.f32.mrf.mxu1  ;;  %v2057_v14 = vpop.f32.mrf.mxu3  ;;  %2148 = vmax.xlane.f32.xlu0 %v2147_v22 }
 0x36f   : > { %v2122_v17 = vmul.f32 0.35355338, %v2057_v14  ;;  %v2078_v23 = vpop.f32.mrf.mxu0 }
 0x371   : > { %v2138_v25 = vsel %vm1965_vm2, %v2122_v17, -inf }
 0x372   : > { %v2116_v24 = vpop.f32.mrf.mxu2 }
 0x373   : > { %2139 = vmax.xlane.f32.xlu1 %v2138_v25 }
 0x376   : > { %v2059_v27 = vpop.f32.mrf.mxu3 }
 0x382   : > { %3539 = vrot.lane.b32.xlu0 %v3538_v32, %s3964_s22 }
 0x383   : > { %3544 = vrot.lane.b32.xlu2 %v3538_v32, %s3963_s27 }
 0x38c   : > { %3549 = vrot.lane.b32.xlu1 %v3538_v32, %s3962_s24 }
 0x3cd   : > { %v2134_v33 = vpop.xlane.xlu0 %2133 }
 0x3ce   : > { %v2152_v60 = vsub.f32 %v2120_v59, %v2134_v33  ;;  %v2131_v44 = vpop.xlane.xlu2 %2130 }
 0x3cf   : > { %v2151_v45 = vsub.f32 %v2119_v62, %v2131_v44 }
 0x3d0   : > { %v2162_v26 = vmul.f32 1.442695, %v2152_v60 }
 0x3d1   : > { %v2137_v35 = vpop.xlane.xlu1 %2136  ;;  %v2160_v4 = vmul.f32 1.442695, %v2151_v45 }
 0x3d2   : > { %3590 = vpow2.f32 %v2162_v26  ;;  %v2153_v37 = vsub.f32 %v2121_v20, %v2137_v35 }
 0x3d4   : > { %v2164_v63 = vmul.f32 1.442695, %v2153_v37 }
 0x3d6   : > { %3592 = vpow2.f32 %v2164_v63  ;;  %v2128_v3 = vpop.xlane.xlu2 %2127 }
 0x3d7   : > { %v2150_v40 = vsub.f32 %v2118_v2, %v2128_v3 }
 0x3d8   : > { %v4711_v41 = vpop.eup %3590 }
 0x3d9   : > { %v2158_v42 = vmul.f32 1.442695, %v2150_v40  ;;  %v2180_v46 = vsel %vm1965_vm2, %v4711_v41, 0.0 }
 0x3da   : > { %2181 = vadd.xlane.f32.xlu1 %v2180_v46 }
 0x3db   : > { %3594 = vpow2.f32 %v2158_v42 }
 0x3dc   : > { %v4715_v47 = vpop.eup %3592  ;;  %3596 = vpow2.f32 %v2160_v4 }
 0x3dd   : > { %v2183_v49 = vsel %vm1965_vm2, %v4715_v47, 0.0 }
 0x3de   : > { %v2143_v50 = vpop.xlane.xlu1 %2142  ;;  %v2146_v54 = vpop.xlane.xlu2 %2145  ;;  %2184 = vadd.xlane.f32.xlu2 %v2183_v49 }
 0x3df   : > { %v2156_v51 = vsub.f32 %v2124_v9, %v2146_v54  ;;  %v2155_v20 = vsub.f32 %v4690_v43, %v2143_v50 }
 0x3e1   : > { %v4719_v52 = vpop.eup %3594  ;;  %v2170_v21 = vmul.f32 1.442695, %v2156_v51  ;;  %v2149_v55 = vpop.xlane.xlu0 %2148  ;;  %v2168_v36 = vmul.f32 1.442695, %v2155_v20 }
 0x3e2   : > { %v2157_v39 = vsub.f32 %v2125_v16, %v2149_v55  ;;  %v2174_v57 = vsel %vm1965_vm2, %v4719_v52, 0.0  ;;  %v4723_v31 = vpop.eup %3596 }
 0x3e3   : > { %2175 = vadd.xlane.f32.xlu0 %v2174_v57  ;;  %3598 = vpow2.f32 %v2170_v21  ;;  %v2177_v18 = vsel %vm1965_vm2, %v4723_v31, 0.0 }
 0x3e4   : > { %v2172_v30 = vmul.f32 1.442695, %v2157_v39 }
 0x3e6   : > { %v2140_v59 = vpop.xlane.xlu1 %2139  ;;  %3600 = vpow2.f32 %v2172_v30  ;;  %v3545_v2 = vpop.permute.xlu2 %3544 }
 0x3e7   : > { %v2154_v62 = vsub.f32 %v2122_v17, %v2140_v59  ;;  %v3547_v8 = vunpack.i.h.bf16 %v3545_v2  ;;  %v3546_v38 = vunpack.i.l.bf16 %v3545_v2 }
 0x3e9   : > { %v4725_v61 = vpop.eup %3598  ;;  %v2166_v1 = vmul.f32 1.442695, %v2154_v62  ;;  %v1793_v9 = vrot.slane %v3547_v8, 4  ;;  %v1737_v5 = vrot.slane %v3546_v38, 4  ;;  %v1796_v16 = vsel %vm1173_vm0, %v3547_v8, %v1795_v10 }
 0x3ea   : > { %v2192_v19 = vsel %vm1965_vm2, %v4725_v61, 0.0  ;;  %v1740_v53 = vsel %vm1173_vm0, %v3546_v38, %v1739_v13  ;;  %v1804_v27 = vperm.slane %v1796_v16, %v4422_v48 }
 0x3eb   : > { %2178 = vadd.xlane.f32.xlu0 %v2177_v18  ;;  %2193 = vadd.xlane.f32.xlu1 %v2192_v19  ;;  %3602 = vpow2.f32 %v2166_v1  ;;  %v1794_v22 = vsel %vm1173_vm0, %v1793_v9, %v4702_v15  ;;  %v1738_v24 = vsel %vm1173_vm0, %v1737_v5, %v4704_v28  ;;  %v1748_v56 = vperm.slane %v1740_v53, %v4422_v48 }
 0x3ec   : > { %v4732_v34 = vpop.eup %3600  ;;  %3604 = vpow2.f32 %v2168_v36  ;;  %v1800_v25 = vperm.slane %v1794_v22, %v4422_v48  ;;  %v1744_v26 = vperm.slane %v1738_v24, %v4422_v48  ;;  %v1831_v3 = vrot.slane %v1804_v27, 4 }
 0x3ed   : > { %v2195_v58 = vsel %vm1965_vm2, %v4732_v34, 0.0  ;;  %v1775_v46 = vrot.slane %v1748_v56, 4 }
 0x3ee   : > { %v1819_v42 = vrot.slane %v1800_v25, 4  ;;  %v1763_v55 = vrot.slane %v1744_v26, 4 }
 0x3f1   : > { %v4736_v6 = vpop.eup %3602 }
 0x3f2   : > { %v2186_v7 = vsel %vm1965_vm2, %v4736_v6, 0.0  ;;  %v4741_v11 = vpop.eup %3604 }
 0x3f3   : > { %2196 = vadd.xlane.f32.xlu0 %v2195_v58  ;;  %2187 = vadd.xlane.f32.xlu2 %v2186_v7  ;;  %v2189_v23 = vsel %vm1965_vm2, %v4741_v11, 0.0 }
 0x3f4   : > { %v3540_v43 = vpop.permute.xlu0 %3539 }
 0x3f5   : > { %v3542_v14 = vunpack.i.h.bf16 %v3540_v43  ;;  %v3541_v17 = vunpack.i.l.bf16 %v3540_v43 }
 0x3f7   : > { %v1807_v33 = vrot.slane %v3542_v14, 4  ;;  %v1751_v15 = vrot.slane %v3541_v17, 4 }
 0x3fb   : > { %2190 = vadd.xlane.f32.xlu2 %v2189_v23 }
 0x3fe   : > { %v3550_v32 = vpop.permute.xlu1 %3549 }
 0x3ff   : > { %v3552_v60 = vunpack.i.h.bf16 %v3550_v32  ;;  %v3551_v44 = vunpack.i.l.bf16 %v3550_v32 }
 0x401   : > { %v1805_v35 = vrot.slane %v3552_v60, 4  ;;  %v1808_v37 = vsel %vm1173_vm0, %v3552_v60, %v1807_v33  ;;  %v1749_v63 = vrot.slane %v3551_v44, 4  ;;  %v1752_v28 = vsel %vm1173_vm0, %v3551_v44, %v1751_v15 }
 0x402   : > { %v1816_v40 = vperm.slane %v1808_v37, %v4422_v48  ;;  %v1760_v45 = vperm.slane %v1752_v28, %v4422_v48 }
 0x403   : > { %v1806_v4 = vsel %vm1173_vm0, %v1805_v35, %v3542_v14  ;;  %v1750_v49 = vsel %vm1173_vm0, %v1749_v63, %v3541_v17 }
 0x404   : > { %v1812_v50 = vperm.slane %v1806_v4, %v4422_v48  ;;  %v1829_v54 = vrot.slane %v1816_v40, 4  ;;  %v1832_v51 = vsel %vm1173_vm0, %v1816_v40, %v1831_v3  ;;  %v1756_v21 = vperm.slane %v1750_v49, %v4422_v48 }
 0x405   : > { %v1840_v39 = vperm.slane %v1832_v51, %v4433_v0  ;;  %v1773_v57 = vrot.slane %v1760_v45, 4  ;;  %v1776_v30 = vsel %vm1173_vm0, %v1760_v45, %v1775_v46 }
 0x406   : > { %v1817_v59 = vrot.slane %v1812_v50, 4  ;;  %v1820_v62 = vsel %vm1173_vm0, %v1812_v50, %v1819_v42  ;;  %v1830_v1 = vsel %vm1173_vm0, %v1829_v54, %v1804_v27  ;;  %v1761_v18 = vrot.slane %v1756_v21, 4 }
 0x407   : > { %v1828_v20 = vperm.slane %v1820_v62, %v4433_v0  ;;  %v1836_v19 = vperm.slane %v1830_v1, %v4433_v0  ;;  %v1847_v36 = vrot.slane %v1840_v39, 4  ;;  %v1764_v2 = vsel %vm1173_vm0, %v1756_v21, %v1763_v55 }
 0x408   : > { %v1818_v58 = vsel %vm1173_vm0, %v1817_v59, %v1800_v25  ;;  %v1762_v8 = vsel %vm1173_vm0, %v1761_v18, %v1744_v26  ;;  %v1772_v7 = vperm.slane %v1764_v2, %v4433_v0  ;;  %v1774_v38 = vsel %vm1173_vm0, %v1773_v57, %v1748_v56 }
 0x409   : > { %v1824_v9 = vperm.slane %v1818_v58, %v4433_v0  ;;  %v1843_v10 = vrot.slane %v1828_v20, 4  ;;  %v1845_v43 = vrot.slane %v1836_v19, 4  ;;  %v1848_v13 = vsel %vm1173_vm0, 0.0, %v1847_v36 }
 0x40a   : > { %v1914_v5 = vsel %vm1173_vm0, %v1847_v36, %v1836_v19  ;;  %v1919_v16 = vrot.slane %v1848_v13, 4  ;;  %v1768_v22 = vperm.slane %v1762_v8, %v4433_v0  ;;  %v1780_v53 = vperm.slane %v1774_v38, %v4433_v0 }
 0x40b   : > { %v1841_v14 = vrot.slane %v1824_v9, 4  ;;  %v1844_v17 = vsel %vm1173_vm0, 0.0, %v1843_v10  ;;  %v1846_v23 = vsel %vm1173_vm0, 0.0, %v1845_v43  ;;  %v1918_v24 = vperm.slane %v1914_v5, %v4422_v48 }
 0x40c   : > { %v1908_v25 = vrot.slane %v1844_v17, 4  ;;  %v1784_v27 = vperm.slane %v1776_v30, %v4433_v0  ;;  %v1785_v56 = vrot.slane %v1768_v22, 4  ;;  %v1787_v32 = vrot.slane %v1772_v7, 4 }
 0x40d   : > { %v1789_v33 = vrot.slane %v1780_v53, 4  ;;  %v1842_v15 = vsel %vm1173_vm0, 0.0, %v1841_v14  ;;  %v1903_v60 = vsel %vm1173_vm0, %v1843_v10, %v1824_v9  ;;  %v1920_v44 = vsel %vm1173_vm0, %v1919_v16, %v1846_v23 }
 0x40e   : > { %v1788_v26 = vsel %vm1173_vm0, 0.0, %v1787_v32  ;;  %v1791_v35 = vrot.slane %v1784_v27, 4  ;;  %v1786_v37 = vsel %vm1173_vm0, 0.0, %v1785_v56  ;;  %v1849_v63 = vsel %vm1173_vm0, %v1787_v32, %v1768_v22 }
 0x40f   : > { %v1790_v28 = vsel %vm1173_vm0, 0.0, %v1789_v33  ;;  %v1854_v3 = vrot.slane %v1788_v26, 4  ;;  %v1853_v40 = vperm.slane %v1849_v63, %v4422_v48  ;;  %v1907_v45 = vperm.slane %v1903_v60, %v4422_v48 }
 0x410   : > { %v1792_v42 = vsel %vm1173_vm0, 0.0, %v1791_v35  ;;  %v1860_v46 = vsel %vm1173_vm0, %v1791_v35, %v1780_v53  ;;  %v1909_v4 = vsel %vm1173_vm0, %v1908_v25, %v1842_v15  ;;  %v1924_v49 = vperm.slane %v1920_v44, %v4422_v48 }
 0x411   : > { %v1864_v50 = vperm.slane %v1860_v46, %v4422_v48  ;;  %v1865_v54 = vrot.slane %v1792_v42, 4  ;;  %v1855_v51 = vsel %vm1173_vm0, %v1854_v3, %v1786_v37  ;;  %v1873_v21 = vrot.slane %v1853_v40, 4 }
 0x412   : > { %v1859_v55 = vperm.slane %v1855_v51, %v4422_v48  ;;  %v1913_v39 = vperm.slane %v1909_v4, %v4422_v48  ;;  %v1927_v57 = vrot.slane %v1907_v45, 4  ;;  %v1939_v30 = vrot.slane %v1918_v24, 4 }
 0x413   : > { %v1866_v59 = vsel %vm1173_vm0, %v1865_v54, %v1790_v28  ;;  %v1885_v62 = vrot.slane %v1864_v50, 4  ;;  %v1937_v1 = vrot.slane %v1924_v49, 4 }
 0x414   : > { %v1870_v18 = vperm.slane %v1866_v59, %v4422_v48  ;;  %v1874_v20 = vsel %vm1173_vm0, %v1859_v55, %v1873_v21  ;;  %v1928_v19 = vsel %vm1173_vm0, %v1913_v39, %v1927_v57  ;;  %v1940_v36 = vsel %vm1173_vm0, %v1924_v49, %v1939_v30 }
 0x415   : > { %v1882_v2 = vperm.slane %v1874_v20, %v4433_v0  ;;  %v1936_v58 = vperm.slane %v1928_v19, %v4433_v0  ;;  %v1948_v8 = vperm.slane %v1940_v36, %v4433_v0  ;;  %v1871_v7 = vrot.slane %v1859_v55, 4 }
 0x416   : > { %v1886_v38 = vsel %vm1173_vm0, %v1870_v18, %v1885_v62  ;;  %v1883_v9 = vrot.slane %v1870_v18, 4  ;;  %v1925_v10 = vrot.slane %v1913_v39, 4  ;;  %v1938_v43 = vsel %vm1173_vm0, %v1937_v1, %v1918_v24 }
 0x417   : > { %v1894_v13 = vperm.slane %v1886_v38, %v4433_v0  ;;  %v1953_v5 = vrot.slane %v1948_v8, 4  ;;  %v1872_v16 = vsel %vm1173_vm0, %v1871_v7, %v1853_v40  ;;  %v1901_v22 = vrot.slane %v1882_v2, 4 }
 0x418   : > { %v1878_v53 = vperm.slane %v1872_v16, %v4433_v0  ;;  %v1884_v14 = vsel %vm1173_vm0, %v1883_v9, %v1864_v50  ;;  %v1926_v17 = vsel %vm1173_vm0, %v1925_v10, %v1907_v45  ;;  %v1944_v23 = vperm.slane %v1938_v43, %v4433_v0 }
 0x419   : > { %v1899_v25 = vrot.slane %v1894_v13, 4  ;;  %v1954_v27 = vsel %vm1173_vm0, %v1953_v5, %v1936_v58  ;;  %v1890_v56 = vperm.slane %v1884_v14, %v4433_v0  ;;  %v1902_v24 = vsel %vm1173_vm0, %v1894_v13, %v1901_v22 }
 0x41a   : > { %v1963_v32 = vpack.c.bf16 %v1954_v27, %v1954_v27  ;;  %v1960_v33 = vpack.c.bf16 %v1902_v24, %v1902_v24  ;;  %v1932_v15 = vperm.slane %v1926_v17, %v4433_v0  ;;  %v1949_v60 = vrot.slane %v1944_v23, 4 }
 0x41b   : > { %v1900_v44 = vsel %vm1173_vm0, %v1899_v25, %v1882_v2  ;;  %v1895_v26 = vrot.slane %v1890_v56, 4  ;;  %v1955_v35 = vrot.slane %v1936_v58, 4  ;;  %v1897_v37 = vrot.slane %v1878_v53, 4 }
 0x41c   : > { %v1959_v63 = vpack.c.bf16 %v1900_v44, %v1900_v44  ;;  %v2341_v28 = vsel %vm2225_vm3, %v1963_v32, 0  ;;  %v2284_v3 = vsel %vm2225_vm3, %v1960_v33, 0  ;;  %v1950_v40 = vsel %vm1173_vm0, %v1949_v60, %v1932_v15 }
 0x41d   : > { %v1896_v45 = vsel %vm1173_vm0, %v1895_v26, %v1878_v53  ;;  %2293 = vmatpush.bf16.msrb.mxu2 %v2284_v3  ;;  %v1961_v42 = vpack.c.bf16 %v1950_v40, %v1950_v40  ;;  %v1956_v46 = vsel %vm1173_vm0, %v1948_v8, %v1955_v35  ;;  %v1898_v4 = vsel %vm1173_vm0, %v1890_v56, %v1897_v37 }
 0x41e   : > { %v2265_v49 = vsel %vm2225_vm3, %v1959_v63, 0  ;;  %v1957_v50 = vpack.c.bf16 %v1896_v45, %v1896_v45  ;;  %v1964_v54 = vpack.c.bf16 %v1956_v46, %v1956_v46  ;;  %v1958_v51 = vpack.c.bf16 %v1898_v4, %v1898_v4 }
 0x41f   : > { %2274 = vmatpush.bf16.msrb.mxu1 %v2265_v49  ;;  %v2303_v21 = vsel %vm2225_vm3, %v1961_v42, 0  ;;  %v1951_v55 = vrot.slane %v1932_v15, 4 }
 0x420   : > { %v2227_v39 = vsel %vm2225_vm3, %v1957_v50, 0  ;;  %v2360_v57 = vsel %vm2225_vm3, %v1964_v54, 0  ;;  %v2246_v30 = vsel %vm2225_vm3, %v1958_v51, 0 }
 0x421   : > { %2236 = vmatpush.bf16.msra.mxu3 %v2227_v39  ;;  %2369 = vmatpush.bf16.msra.mxu2 %v2360_v57  ;;  %v1952_v59 = vsel %vm1173_vm0, %v1944_v23, %v1951_v55 }
 0x422   : > { %2255 = vmatpush.bf16.msrb.mxu0 %v2246_v30  ;;  %v1962_v62 = vpack.c.bf16 %v1952_v59, %v1952_v59 }
 0x423   : > { %2350 = vmatpush.bf16.msra.mxu1 %v2341_v28 }
 0x424   : > { %v2322_v1 = vsel %vm2225_vm3, %v1962_v62, 0  ;;  %vm2832_vm3 = vcmask 523264  }
 0x425   : > { %2312 = vmatpush.bf16.msrb.mxu3 %v2303_v21 }
 0x426   : > { %2331 = vmatpush.bf16.msra.mxu0 %v2322_v1 }
 0x44d   : > { %v2182_v18 = vpop.xlane.xlu1 %2181 }
 0x44e   : > { %3606 = vrcp.f32 %v2182_v18 }
 0x451   : > { %v2185_v20 = vpop.xlane.xlu2 %2184 }
 0x452   : > { %3608 = vrcp.f32 %v2185_v20 }
 0x454   : > { %v3607_v19 = vpop.eup %3606 }
 0x455   : > { %v2208_v36 = vmul.f32 %v3607_v19, %v4711_v41 }
 0x456   : > { %v2176_v2 = vpop.xlane.xlu0 %2175 }
 0x457   : > { %v2216_v58 = vpack.c.bf16 %v2208_v36, %v2208_v36  ;;  %3610 = vrcp.f32 %v2176_v2 }
 0x458   : > { %v3609_v8 = vpop.eup %3608 }
 0x459   : > { %v2209_v7 = vmul.f32 %v3609_v8, %v4715_v47  ;;  %3324 = vmatmul.msk.bf16.vlgmr.msrb.gmra.mxu1 %vm1965_vm2, %v2216_v58 }
 0x45b   : > { %v2217_v38 = vpack.c.bf16 %v2209_v7, %v2209_v7 }
 0x45d   : > { %v3611_v9 = vpop.eup %3610  ;;  %3325 = vmatmul.msk.bf16.vlgmr.msrb.gmra.mxu2 %vm1965_vm2, %v2217_v38 }
 0x45e   : > { %v2206_v10 = vmul.f32 %v3611_v9, %v4719_v52  ;;  %v2179_v43 = vpop.xlane.xlu0 %2178  ;;  %v2194_v13 = vpop.xlane.xlu1 %2193 }
 0x45f   : > { %3612 = vrcp.f32 %v2179_v43 }
 0x460   : > { %v2214_v5 = vpack.c.bf16 %v2206_v10, %v2206_v10  ;;  %3614 = vrcp.f32 %v2194_v13 }
 0x462   : > { %3322 = vmatmul.msk.bf16.vlgmr.msra.gmra.mxu3 %vm1965_vm2, %v2214_v5 }
 0x465   : > { %v3613_v41 = vpop.eup %3612 }
 0x466   : > { %v3615_v16 = vpop.eup %3614  ;;  %v2207_v22 = vmul.f32 %v3613_v41, %v4723_v31  ;;  %v2197_v47 = vpop.xlane.xlu0 %2196 }
 0x467   : > { %v2212_v53 = vmul.f32 %v3615_v16, %v4725_v61  ;;  %3616 = vrcp.f32 %v2197_v47  ;;  %v2188_v17 = vpop.xlane.xlu2 %2187 }
 0x468   : > { %v2215_v14 = vpack.c.bf16 %v2207_v22, %v2207_v22  ;;  %3618 = vrcp.f32 %v2188_v17 }
 0x469   : > { %v2220_v23 = vpack.c.bf16 %v2212_v53, %v2212_v53 }
 0x46a   : > { %3323 = vmatmul.msk.bf16.vlgmr.msrb.gmra.mxu0 %vm1965_vm2, %v2215_v14 }
 0x46b   : > { %3328 = vmatmul.msk.bf16.vlgmr.msra.gmra.mxu1 %vm1965_vm2, %v2220_v23 }
 0x46d   : > { %v3617_v52 = vpop.eup %3616 }
 0x46e   : > { %v2213_v25 = vmul.f32 %v3617_v52, %v4732_v34  ;;  %v3619_v27 = vpop.eup %3618 }
 0x46f   : > { %v2210_v24 = vmul.f32 %v3619_v27, %v4736_v6  ;;  %v2191_v31 = vpop.xlane.xlu2 %2190 }
 0x470   : > { %v2221_v56 = vpack.c.bf16 %v2213_v25, %v2213_v25  ;;  %3620 = vrcp.f32 %v2191_v31 }
 0x471   : > { %v2218_v32 = vpack.c.bf16 %v2210_v24, %v2210_v24 }
 0x472   : > { %3329 = vmatmul.msk.bf16.vlgmr.msra.gmra.mxu2 %vm1965_vm2, %v2221_v56 }
 0x473   : > { %3326 = vmatmul.msk.bf16.vlgmr.msrb.gmra.mxu3 %vm1965_vm2, %v2218_v32 }
 0x476   : > { %v3621_v61 = vpop.eup %3620 }
 0x477   : > { %v2211_v33 = vmul.f32 %v3621_v61, %v4741_v11 }
 0x479   : > { %v2219_v15 = vpack.c.bf16 %v2211_v33, %v2211_v33 }
 0x47b   : > { %3327 = vmatmul.msk.bf16.vlgmr.msra.gmra.mxu0 %vm1965_vm2, %v2219_v15 }
 0x4d6   : > { %v2276_v60 = vpop.f32.mrf.mxu1 }
 0x4d7   : > { %v2375_v26 = vrot.slane %v2276_v60, 4 }
 0x4de   : > { %v2278_v44 = vpop.f32.mrf.mxu1 }
 0x4e0   : > { %v2295_v34 = vpop.f32.mrf.mxu2 }
 0x4e1   : > { %v2387_v37 = vrot.slane %v2295_v34, 4 }
 0x4e5   : > { %v2238_v35 = vpop.f32.mrf.mxu3 }
 0x4e6   : > { %v2376_v6 = vsel %vm1173_vm0, %v2375_v26, %v2238_v35  ;;  %v2377_v63 = vrot.slane %v2238_v35, 4 }
 0x4e7   : > { %v2382_v28 = vperm.slane %v2376_v6, %v4422_v48  ;;  %v2257_v3 = vpop.f32.mrf.mxu0 }
 0x4e8   : > { %v2378_v40 = vsel %vm1173_vm0, %v2276_v60, %v2377_v63  ;;  %v2388_v45 = vsel %vm1173_vm0, %v2387_v37, %v2257_v3  ;;  %v2389_v11 = vrot.slane %v2257_v3, 4  ;;  %v2352_v42 = vpop.f32.mrf.mxu1  ;;  %v2297_v46 = vpop.f32.mrf.mxu2 }
 0x4e9   : > { %v2386_v4 = vperm.slane %v2378_v40, %v4422_v48  ;;  %v2401_v49 = vrot.slane %v2382_v28, 4  ;;  %v2394_v50 = vperm.slane %v2388_v45, %v4422_v48  ;;  %v2431_v52 = vrot.slane %v2352_v42, 4 }
 0x4ea   : > { %v2390_v54 = vsel %vm1173_vm0, %v2295_v34, %v2389_v11 }
 0x4eb   : > { %v2413_v51 = vrot.slane %v2386_v4, 4  ;;  %v2398_v21 = vperm.slane %v2390_v54, %v4422_v48  ;;  %v2399_v55 = vrot.slane %v2394_v50, 4  ;;  %v2402_v39 = vsel %vm1173_vm0, %v2394_v50, %v2401_v49 }
 0x4ec   : > { %v2410_v57 = vperm.slane %v2402_v39, %v4433_v0 }
 0x4ed   : > { %v2400_v30 = vsel %vm1173_vm0, %v2399_v55, %v2382_v28  ;;  %v2411_v59 = vrot.slane %v2398_v21, 4  ;;  %v2414_v62 = vsel %vm1173_vm0, %v2398_v21, %v2413_v51  ;;  %v2240_v1 = vpop.f32.mrf.mxu3 }
 0x4ee   : > { %v2406_v18 = vperm.slane %v2400_v30, %v4433_v0  ;;  %v2422_v20 = vperm.slane %v2414_v62, %v4433_v0  ;;  %v2425_v19 = vrot.slane %v2410_v57, 4 }
 0x4ef   : > { %v2412_v36 = vsel %vm1173_vm0, %v2411_v59, %v2386_v4  ;;  %v2259_v2 = vpop.f32.mrf.mxu0 }
 0x4f0   : > { %v2418_v58 = vperm.slane %v2412_v36, %v4433_v0  ;;  %v2423_v8 = vrot.slane %v2406_v18, 4  ;;  %v2426_v7 = vsel %vm1173_vm0, 0.0, %v2425_v19  ;;  %v2429_v38 = vrot.slane %v2422_v20, 4  ;;  %v2354_v9 = vpop.f32.mrf.mxu1 }
 0x4f1   : > { %v2492_v10 = vrot.slane %v2426_v7, 4  ;;  %v2487_v22 = vsel %vm1173_vm0, %v2425_v19, %v2406_v18 }
 0x4f2   : > { %v2424_v43 = vsel %vm1173_vm0, 0.0, %v2423_v8  ;;  %v2427_v13 = vrot.slane %v2418_v58, 4  ;;  %v2430_v5 = vsel %vm1173_vm0, 0.0, %v2429_v38  ;;  %v2498_v53 = vsel %vm1173_vm0, %v2429_v38, %v2418_v58 }
 0x4f3   : > { %v2493_v41 = vsel %vm1173_vm0, %v2492_v10, %v2424_v43  ;;  %v2503_v16 = vrot.slane %v2430_v5, 4  ;;  %v2491_v56 = vperm.slane %v2487_v22, %v4422_v48  ;;  %v2502_v61 = vperm.slane %v2498_v53, %v4422_v48 }
 0x4f4   : > { %v2428_v47 = vsel %vm1173_vm0, 0.0, %v2427_v13  ;;  %v2497_v23 = vperm.slane %v2493_v41, %v4422_v48 }
 0x4f5   : > { %v2371_v14 = vpop.f32.mrf.mxu2  ;;  %v2504_v17 = vsel %vm1173_vm0, %v2503_v16, %v2428_v47  ;;  %v2511_v37 = vrot.slane %v2491_v56, 4  ;;  %v2523_v40 = vrot.slane %v2502_v61, 4 }
 0x4f6   : > { %v2443_v25 = vrot.slane %v2371_v14, 4  ;;  %v2508_v27 = vperm.slane %v2504_v17, %v4422_v48  ;;  %v2314_v24 = vpop.f32.mrf.mxu3  ;;  %v2509_v35 = vrot.slane %v2497_v23, 4 }
 0x4f7   : > { %v2432_v31 = vsel %vm1173_vm0, %v2431_v52, %v2314_v24  ;;  %v2433_v32 = vrot.slane %v2314_v24, 4  ;;  %v2512_v30 = vsel %vm1173_vm0, %v2497_v23, %v2511_v37 }
 0x4f8   : > { %v2521_v33 = vrot.slane %v2508_v27, 4  ;;  %v2438_v15 = vperm.slane %v2432_v31, %v4422_v48  ;;  %v2333_v60 = vpop.f32.mrf.mxu0  ;;  %v2510_v54 = vsel %vm1173_vm0, %v2509_v35, %v2491_v56  ;;  %v2524_v36 = vsel %vm1173_vm0, %v2508_v27, %v2523_v40 }
 0x4f9   : > { %v2434_v44 = vsel %vm1173_vm0, %v2352_v42, %v2433_v32  ;;  %v2444_v34 = vsel %vm1173_vm0, %v2443_v25, %v2333_v60  ;;  %v2445_v26 = vrot.slane %v2333_v60, 4  ;;  %v2516_v2 = vperm.slane %v2510_v54, %v4433_v0 }
 0x4fa   : > { %v2442_v6 = vperm.slane %v2434_v44, %v4422_v48  ;;  %v2457_v63 = vrot.slane %v2438_v15, 4  ;;  %v2450_v28 = vperm.slane %v2444_v34, %v4422_v48  ;;  %v2522_v45 = vsel %vm1173_vm0, %v2521_v33, %v2502_v61 }
 0x4fb   : > { %v2446_v3 = vsel %vm1173_vm0, %v2371_v14, %v2445_v26  ;;  %v2528_v51 = vperm.slane %v2522_v45, %v4433_v0  ;;  %v2520_v43 = vperm.slane %v2512_v30, %v4433_v0  ;;  %v2532_v17 = vperm.slane %v2524_v36, %v4433_v0 }
 0x4fc   : > { %v2469_v11 = vrot.slane %v2442_v6, 4  ;;  %v2454_v46 = vperm.slane %v2446_v3, %v4422_v48  ;;  %v2455_v4 = vrot.slane %v2450_v28, 4  ;;  %v2458_v42 = vsel %vm1173_vm0, %v2450_v28, %v2457_v63 }
 0x4fd   : > { %v2373_v49 = vpop.f32.mrf.mxu2  ;;  %v2466_v50 = vperm.slane %v2458_v42, %v4433_v0  ;;  %v2533_v18 = vrot.slane %v2528_v51, 4  ;;  %v2539_v56 = vrot.slane %v2520_v43, 4  ;;  %v2537_v44 = vrot.slane %v2532_v17, 4 }
 0x4fe   : > { %v2456_v21 = vsel %vm1173_vm0, %v2455_v4, %v2438_v15  ;;  %v2467_v55 = vrot.slane %v2454_v46, 4  ;;  %v2470_v39 = vsel %vm1173_vm0, %v2454_v46, %v2469_v11  ;;  %v2316_v57 = vpop.f32.mrf.mxu3 }
 0x4ff   : > { %v2462_v59 = vperm.slane %v2456_v21, %v4433_v0  ;;  %v2478_v62 = vperm.slane %v2470_v39, %v4433_v0  ;;  %v2481_v1 = vrot.slane %v2466_v50, 4  ;;  %v4906_v13 = vsel %vm1173_vm0, %v2533_v18, %v2516_v2  ;;  %v3384_v57 = vld [vmem:[%s5200_s1] sm:$0xff] }
 0x500   : > { %v2468_v20 = vsel %vm1173_vm0, %v2467_v55, %v2442_v6  ;;  %v2335_v19 = vpop.f32.mrf.mxu0  ;;  %v2535_v6 = vrot.slane %v2516_v2, 4  ;;  %v2538_v4 = vsel %vm1173_vm0, %v2537_v44, %v2520_v43  ;;  %v3573_v43 = vld [vmem:[%s980_s13] ss:$0 sm:$0xff]  ;;  %s5202_s13 = scalar_lea.vmem [#allocation11], %s4266_s2  ;;  %s5204_s2 = scalar_lea.vmem [#allocation10], %s4256_s6 }
 0x501   : > { %v2474_v58 = vperm.slane %v2468_v20, %v4433_v0  ;;  %v2479_v8 = vrot.slane %v2462_v59, 4  ;;  %v2482_v7 = vsel %vm1173_vm0, 0.0, %v2481_v1  ;;  %v2485_v38 = vrot.slane %v2478_v62, 4  ;;  %s5203_s9 = smov %s5202_s13 }
 0x502   : > { %v2541_v9 = vsel %vm1173_vm0, %v2481_v1, %v2462_v59  ;;  %v2546_v10 = vrot.slane %v2482_v7, 4  ;;  %v2536_v49 = vsel %vm1173_vm0, %v2528_v51, %v2535_v6 }
 0x503   : > { %v2480_v5 = vsel %vm1173_vm0, 0.0, %v2479_v8  ;;  %v2483_v41 = vrot.slane %v2474_v58, 4  ;;  %v2486_v16 = vsel %vm1173_vm0, 0.0, %v2485_v38  ;;  %v2545_v22 = vperm.slane %v2541_v9, %v4422_v48 }
 0x504   : > { %v2547_v47 = vsel %vm1173_vm0, %v2546_v10, %v2480_v5  ;;  %v2552_v53 = vsel %vm1173_vm0, %v2485_v38, %v2474_v58  ;;  %v2557_v14 = vrot.slane %v2486_v16, 4  ;;  %v3630_v16 = vld [vmem:[%s4342_s0] sm:$0xff] }
 0x505   : > { %v2551_v23 = vperm.slane %v2547_v47, %v4422_v48  ;;  %v2565_v52 = vrot.slane %v2545_v22, 4  ;;  %v2484_v25 = vsel %vm1173_vm0, 0.0, %v2483_v41  ;;  %v2556_v27 = vperm.slane %v2552_v53, %v4422_v48 }
 0x506   : > { %v2558_v24 = vsel %vm1173_vm0, %v2557_v14, %v2484_v25  ;;  %v3631_v14 = vld [vmem:[%s4342_s0 + $0x8] sm:$0xff] }
 0x507   : > { %v2562_v31 = vperm.slane %v2558_v24, %v4422_v48  ;;  %v2566_v32 = vsel %vm1173_vm0, %v2551_v23, %v2565_v52  ;;  %v2577_v61 = vrot.slane %v2556_v27, 4  ;;  %v2563_v33 = vrot.slane %v2551_v23, 4 }
 0x508   : > { %v2574_v15 = vperm.slane %v2566_v32, %v4433_v0  ;;  %v2540_v48 = vsel %vm1173_vm0, %v2532_v17, %v2539_v56 }
 0x509   : > { %v2578_v60 = vsel %vm1173_vm0, %v2562_v31, %v2577_v61  ;;  %v2564_v34 = vsel %vm1173_vm0, %v2563_v33, %v2545_v22  ;;  %v2575_v26 = vrot.slane %v2562_v31, 4 }
 0x50a   : > { %v2586_v35 = vperm.slane %v2578_v60, %v4433_v0  ;;  %v2593_v37 = vrot.slane %v2574_v15, 4  ;;  %v2570_v63 = vperm.slane %v2564_v34, %v4433_v0  ;;  %v3387_v34 = vld [vmem:[%s5202_s13 + $0x8] sm:$0xff] }
 0x50b   : > { %v2576_v28 = vsel %vm1173_vm0, %v2575_v26, %v2556_v27  ;;  %2785 = vmatpush.bf16.msrb.mxu0 %v3387_v34  ;;  %v3386_v26 = vld [vmem:[%s5203_s9] sm:$0xff] }
 0x50c   : > { %v2594_v3 = vsel %vm1173_vm0, %v2586_v35, %v2593_v37  ;;  %v2591_v40 = vrot.slane %v2586_v35, 4  ;;  %v2582_v45 = vperm.slane %v2576_v28, %v4433_v0  ;;  %v2589_v11 = vrot.slane %v2570_v63, 4  ;;  %v3385_v0 = vld [vmem:[%s5199_s30 + $0x8] sm:$0xff] }
 0x50d   : > { %v3563_v46 = vpack.i.bf16 %v2594_v3, %v2540_v48  ;;  %2657 = vmatpush.bf16.msra.mxu3 %v3385_v0  ;;  %v3576_v34 = vld [vmem:[%s989_s7] ss:$0 sm:$0xff]  ;;  %s5208_s7 = sld [smem:[#allocation24_spill]] }
 0x50e   : > { %v2592_v42 = vsel %vm1173_vm0, %v2591_v40, %v2574_v15  ;;  %v2587_v50 = vrot.slane %v2582_v45, 4  ;;  %v2590_v54 = vsel %vm1173_vm0, %v2582_v45, %v2589_v11 }
 0x50f   : > { %3564 = vrot.lane.b32.xlu2 %v3563_v46, %s3967_s11  ;;  %v3558_v21 = vpack.i.bf16 %v2592_v42, %v2538_v4  ;;  %v3553_v55 = vpack.i.bf16 %v2590_v54, %v2536_v49  ;;  %2786 = vmatpush.bf16.msrb.mxu0 %v3386_v26 }
 0x510   : > { %v2588_v39 = vsel %vm1173_vm0, %v2587_v50, %v2570_v63 }
 0x511   : > { %3559 = vrot.lane.b32.xlu1 %v3558_v21, %s3968_s28  ;;  %3554 = vrot.lane.b32.xlu0 %v3553_v55, %s3969_s10 }
 0x512   : > { %2658 = vmatpush.bf16.msra.mxu3 %v3384_v57 }
 0x513   : > { %p3365_p10 = scmp.ge.s32.totalorder %s5208_s7, 1 }
 0x569   : > { %v3565_v51 = vpop.permute.xlu2 %3564 }
 0x56a   : > { %v3567_v19 = vunpack.i.h.bf16 %v3565_v51  ;;  %v3566_v36 = vunpack.i.l.bf16 %v3565_v51 }
 0x583   : > { %v3560_v30 = vpop.permute.xlu1 %3559  ;;  %v3555_v59 = vpop.permute.xlu0 %3554 }
 0x584   : > { %v3562_v62 = vunpack.i.h.bf16 %v3560_v30  ;;  %v3561_v1 = vunpack.i.l.bf16 %v3560_v30  ;;  %v3557_v18 = vunpack.i.h.bf16 %v3555_v59  ;;  %v3556_v20 = vunpack.i.l.bf16 %v3555_v59 }
 0x586   : > { %v2619_v2 = vsel %vm1965_vm2, %v4906_v13, %v3556_v20  ;;  %v2620_v58 = vsel %vm1965_vm2, %v2588_v39, %v3557_v18 }
 0x587   : > { %v2622_v8 = vsel %vm2621_vm4, %v2619_v2, %v3561_v1  ;;  %v2623_v7 = vsel %vm2621_vm4, %v2620_v58, %v3562_v62 }
 0x588   : > { %v2625_v38 = vsel %vm2624_vm5, %v2622_v8, %v3566_v36  ;;  %v2626_v9 = vsel %vm2624_vm5, %v2623_v7, %v3567_v19 }
 0x589   : > { %v2627_v10 = vpack.c.bf16 %v2626_v9, %v2625_v38 }
 0x58b   : > { %3338 = vmatmul.msk.bf16.vlgmr.msra.gmra.mxu3 %vm1013_vm1, %v2627_v10 }
 0x60e   : > { %v2660_v5 = vpop.f32.mrf.mxu3 }
 0x60f   : > { %v2661_v41 = vadd.f32 %v3573_v43, %v2660_v5 }
 0x611   : > { %v4949_v22 = vadd.f32 %v3630_v16, %v2661_v41 }
 0x613   : > { %v2669_v13 = vsel %vm1013_vm1, %v4949_v22, 0.0 }
 0x614   : > { %2670 = vadd.xlane.f32.xlu0 %v2669_v13 }
 0x616   : > { %v2662_v47 = vpop.f32.mrf.mxu3 }
 0x617   : > { %v2663_v53 = vadd.f32 %v3573_v43, %v2662_v47  ;;  %v3574_v47 = vld [vmem:[%s5204_s2] ss:$0 sm:$0xff] }
 0x619   : > { %v4954_v17 = vadd.f32 %v3631_v14, %v2663_v53 }
 0x61b   : > { %v2672_v23 = vsel %vm1013_vm1, %v4954_v17, 0.0 }
 0x61c   : > { %2673 = vadd.xlane.f32.xlu1 %v2672_v23 }
 0x687   : > { %v2671_v52 = vpop.xlane.xlu0 %2670 }
 0x688   : > { %v2675_v25 = vmul.f32 %v2671_v52, %v4351_v12 }
 0x68a   : > { %v4960_v27 = vsub.f32 %v4949_v22, %v2675_v25 }
 0x68c   : > { %v2679_v56 = vmul.f32 %v4960_v27, %v4960_v27 }
 0x68e   : > { %v2681_v24 = vsel %vm1013_vm1, %v2679_v56, 0.0  ;;  %v3575_v56 = vld [vmem:[%s986_s15] ss:$0 sm:$0xff] }
 0x68f   : > { %v2674_v31 = vpop.xlane.xlu1 %2673  ;;  %2682 = vadd.xlane.f32.xlu2 %v2681_v24 }
 0x690   : > { %v2676_v32 = vmul.f32 %v2674_v31, %v4351_v12 }
 0x692   : > { %v4967_v61 = vsub.f32 %v4954_v17, %v2676_v32 }
 0x694   : > { %v2680_v33 = vmul.f32 %v4967_v61, %v4967_v61 }
 0x696   : > { %v2684_v15 = vsel %vm1013_vm1, %v2680_v33, 0.0  ;;  %v3391_v33 = vld [vmem:[%s4340_s16 + $0x18] sm:$0xff] }
 0x697   : > { %2685 = vadd.xlane.f32.xlu0 %v2684_v15  ;;  %2840 = vmatpush.bf16.msrb.mxu1 %v3391_v33  ;;  %v3390_v15 = vld [vmem:[%s4340_s16 + $0x10] sm:$0xff] }
 0x69b   : > { %2841 = vmatpush.bf16.msrb.mxu1 %v3390_v15 }
 0x702   : > { %v2683_v60 = vpop.xlane.xlu2 %2682 }
 0x703   : > { %v2687_v44 = vmul.f32 %v2683_v60, %v4365_v29  ;;  %v3389_v60 = vld [vmem:[%s4340_s16 + $0x8] sm:$0xff] }
 0x704   : > { %2842 = vmatpush.bf16.msrb.mxu1 %v3389_v60 }
 0x705   : > { %3622 = vrsqrt.f32 %v2687_v44  ;;  %vm2696_vm6 = vcmp.eq.f32.partialorder %v2687_v44, inf  ;;  %v2699_v42 = vand.u32 2147483648, %v2687_v44  ;;  %vm2698_vm7 = vcmp.eq.f32.partialorder %v2687_v44, 0.0 }
 0x70a   : > { %v2686_v35 = vpop.xlane.xlu0 %2685 }
 0x70b   : > { %v3623_v37 = vpop.eup %3622  ;;  %v2688_v6 = vmul.f32 %v2686_v35, %v4365_v29 }
 0x70c   : > { %v2690_v63 = vmul.f32 %v3623_v37, %v2687_v44 }
 0x70d   : > { %3624 = vrsqrt.f32 %v2688_v6  ;;  %vm2708_vm8 = vcmp.eq.f32.partialorder %v2688_v6, inf  ;;  %v2711_v57 = vand.u32 2147483648, %v2688_v6  ;;  %vm2710_vm9 = vcmp.eq.f32.partialorder %v2688_v6, 0.0 }
 0x70e   : > { %v2691_v48 = vmul.f32 %v3623_v37, %v2690_v63 }
 0x710   : > { %v2692_v28 = vmul.f32 0.5, %v2691_v48 }
 0x712   : > { %v2693_v3 = vsub.f32 1.5, %v2692_v28  ;;  %v3577_v28 = vld [vmem:[%s997_s20] ss:$0 sm:$0xff] }
 0x713   : > { %v3625_v40 = vpop.eup %3624 }
 0x714   : > { %v2694_v45 = vmul.f32 %v3623_v37, %v2693_v3  ;;  %v2702_v11 = vmul.f32 %v3625_v40, %v2688_v6 }
 0x716   : > { %v2695_v46 = vmul.f32 %v2694_v45, %v2687_v44  ;;  %v2703_v4 = vmul.f32 %v3625_v40, %v2702_v11 }
 0x718   : > { %v2697_v49 = vsel %vm2696_vm6, %v2687_v44, %v2695_v46  ;;  %v2704_v50 = vmul.f32 0.5, %v2703_v4 }
 0x719   : > { %v2700_v54 = vsel %vm2698_vm7, %v2699_v42, %v2697_v49 }
 0x71a   : > { %v2713_v21 = vadd.f32 1e-06, %v2700_v54  ;;  %v2705_v55 = vsub.f32 1.5, %v2704_v50 }
 0x71c   : > { %3626 = vrcp.f32 %v2713_v21  ;;  %v2706_v39 = vmul.f32 %v3625_v40, %v2705_v55  ;;  %v2726_v19 = vand.u32 2147483648, %v2713_v21  ;;  %vm2720_vm11 = vweird.f32 %v2713_v21 }
 0x71d   : > { %v2724_v2 = vand.u32 2147483647, %v2713_v21 }
 0x71e   : > { %v2707_v0 = vmul.f32 %v2706_v39, %v2688_v6  ;;  %v2727_v38 = vor.u32 1.1754944e-38, %v2726_v19 }
 0x71f   : > { %vm2725_vm13 = vcmp.eq.f32.partialorder %v2724_v2, 8.507059e+37 }
 0x720   : > { %v2709_v51 = vsel %vm2708_vm8, %v2688_v6, %v2707_v0 }
 0x721   : > { %v2712_v30 = vsel %vm2710_vm9, %v2711_v57, %v2709_v51 }
 0x722   : > { %v3627_v59 = vpop.eup %3626  ;;  %v2714_v62 = vadd.f32 1e-06, %v2712_v30 }
 0x723   : > { %v2716_v1 = vmul.f32 %v3627_v59, %v2713_v21  ;;  %vm2721_vm10 = vweird.f32 %v3627_v59 }
 0x724   : > { %3628 = vrcp.f32 %v2714_v62  ;;  %vm2722_vm12 = vmor %vm2720_vm11, %vm2721_vm10  ;;  %v2740_v43 = vand.u32 2147483648, %v2714_v62  ;;  %v2738_v41 = vand.u32 2147483647, %v2714_v62  ;;  %vm2734_vm15 = vweird.f32 %v2714_v62 }
 0x725   : > { %v2717_v18 = vsub.f32 1.0, %v2716_v1 }
 0x726   : > { %v2741_v53 = vor.u32 1.1754944e-38, %v2740_v43  ;;  %vm2739_vm2 = vcmp.eq.f32.partialorder %v2738_v41, 8.507059e+37 }
 0x727   : > { %v2718_v20 = vmul.f32 %v3627_v59, %v2717_v18 }
 0x729   : > { %v2719_v36 = vadd.f32 %v3627_v59, %v2718_v20 }
 0x72a   : > { %v3629_v58 = vpop.eup %3628 }
 0x72b   : > { %v2723_v8 = vsel %vm2722_vm12, %v3627_v59, %v2719_v36  ;;  %v2730_v7 = vmul.f32 %v3629_v58, %v2714_v62  ;;  %vm2735_vm14 = vweird.f32 %v3629_v58 }
 0x72c   : > { %v2728_v10 = vsel %vm2725_vm13, %v2727_v38, %v2723_v8  ;;  %vm2736_vm0 = vmor %vm2734_vm15, %vm2735_vm14 }
 0x72d   : > { %v2731_v9 = vsub.f32 1.0, %v2730_v7  ;;  %v2743_v13 = vmul.f32 %v2728_v10, %v4960_v27 }
 0x72f   : > { %v2732_v5 = vmul.f32 %v3629_v58, %v2731_v9  ;;  %v2748_v25 = vmul.f32 %v3574_v47, %v2743_v13 }
 0x731   : > { %v2733_v16 = vadd.f32 %v3629_v58, %v2732_v5  ;;  %v2753_v24 = vadd.f32 %v3575_v56, %v2748_v25 }
 0x733   : > { %v2737_v14 = vsel %vm2736_vm0, %v3629_v58, %v2733_v16 }
 0x734   : > { %v2742_v23 = vsel %vm2739_vm2, %v2741_v53, %v2737_v14 }
 0x735   : > { %v2744_v52 = vmul.f32 %v2742_v23, %v4967_v61  ;;  %v3388_v61 = vld [vmem:[%s4340_s16] sm:$0xff] }
 0x736   : > { %2843 = vmatpush.bf16.msrb.mxu1 %v3388_v61 }
 0x737   : > { %v2749_v27 = vmul.f32 %v3574_v47, %v2744_v52 }
 0x739   : > { %v2754_v31 = vadd.f32 %v3575_v56, %v2749_v27 }
 0x73b   : > { %v2755_v32 = vpack.c.bf16 %v2754_v31, %v2753_v24 }
 0x73d   : > { %3347 = vmatmul.msk.bf16.vlgmr.msrb.gmra.mxu0 %vm1013_vm1, %v2755_v32 }
 0x7ba   : > { %v2788_v44 = vpop.f32.mrf.mxu0 }
 0x7bb   : > { %v2789_v26 = vadd.f32 %v3576_v34, %v2788_v44 }
 0x7bd   : > { %v2793_v6 = vmax.f32 %v2789_v26, 0.0 }
 0x7c2   : > { %v2790_v35 = vpop.f32.mrf.mxu0 }
 0x7c3   : > { %v2791_v37 = vadd.f32 %v3576_v34, %v2790_v35 }
 0x7c5   : > { %v2794_v63 = vmax.f32 %v2791_v37, 0.0 }
 0x7c7   : > { %v2795_v48 = vpack.c.bf16 %v2794_v63, %v2793_v6 }
 0x7c9   : > { %3364 = vmatmul.msk.bf16.vlgmr.msrb.gmra.mxu1 %vm2832_vm3, %v2795_v48 }
 0x846   : > { %v2845_v3 = vpop.f32.mrf.mxu1 }
 0x847   : > { %v2846_v40 = vadd.f32 %v3577_v28, %v2845_v3 }
 0x849   : > { %v2850_v45 = vadd.f32 %v2846_v40, %v4949_v22 }
 0x84d   : > { %2855 = sbr.rel (%p3365_p10) target bundleno = 2132 (0x854), region = 128 }
 0x84e   : > { %v2847_v11 = vpop.f32.mrf.mxu1 }
 0x84f   : > { %v2848_v46 = vadd.f32 %v3577_v28, %v2847_v11 }
 0x851   : > { %v2851_v4 = vadd.f32 %v2848_v46, %v4954_v17 }
 0x852   : > { %2856 = vst.msk [vmem:[%s4342_s0] sm:$0xff] %vm1013_vm1, %v2850_v45 }
 0x853   : > { %2857 = vst.msk [vmem:[%s4342_s0 + $0x8] sm:$0xff] %vm1013_vm1, %v2851_v4 }
 0x854 PF: > { %s5209_s21 = sld [smem:[#allocation24_spill]] }
 0x85a   : > { %p3366_p11 = scmp.ne.s32.totalorder %s5209_s21, 1 }
 0x85b   : > { %s5210_s22 = sld [smem:[#allocation51_spill]] (!%p3366_p11) }
 0x85c   : > { %2861 = sbr.rel (%p3366_p11) target bundleno = 2442 (0x98a), region = 132  ;;  %s5211_s17 = sld [smem:[#allocation52_spill]] (!%p3366_p11) }
 0x861   : > { %v2864_v42 = vsel %vm1013_vm1, %v2850_v45, 0.0  ;;  %v2867_v22 = vsel %vm1013_vm1, %v2851_v4, 0.0  ;;  %v3632_v61 = vld [vmem:[%s5210_s22] ss:$0 sm:$0xff] }
 0x862   : > { %2865 = vadd.xlane.f32.xlu0 %v2864_v42  ;;  %v3633_v35 = vld [vmem:[%s5211_s17] ss:$0 sm:$0xff] }
 0x86a   : > { %2868 = vadd.xlane.f32.xlu0 %v2867_v22 }
 0x8d5   : > { %v2866_v17 = vpop.xlane.xlu0 %2865 }
 0x8d6   : > { %v2870_v49 = vmul.f32 %v2866_v17, %v4351_v12 }
 0x8d8   : > { %v2872_v50 = vsub.f32 %v2850_v45, %v2870_v49 }
 0x8da   : > { %v2874_v54 = vmul.f32 %v2872_v50, %v2872_v50 }
 0x8dc   : > { %v2876_v21 = vsel %vm1013_vm1, %v2874_v54, 0.0 }
 0x8dd   : > { %2877 = vadd.xlane.f32.xlu1 %v2876_v21  ;;  %v2869_v55 = vpop.xlane.xlu0 %2868 }
 0x8de   : > { %v2871_v39 = vmul.f32 %v2869_v55, %v4351_v12 }
 0x8e0   : > { %v5015_v0 = vsub.f32 %v2851_v4, %v2871_v39 }
 0x8e2   : > { %v2875_v57 = vmul.f32 %v5015_v0, %v5015_v0 }
 0x8e4   : > { %v2879_v51 = vsel %vm1013_vm1, %v2875_v57, 0.0 }
 0x8e5   : > { %2880 = vadd.xlane.f32.xlu1 %v2879_v51 }
 0x950   : > { %v2878_v30 = vpop.xlane.xlu1 %2877 }
 0x951   : > { %v2882_v59 = vmul.f32 %v2878_v30, %v4365_v29 }
 0x953   : > { %3634 = vrsqrt.f32 %v2882_v59  ;;  %vm2891_vm4 = vcmp.eq.f32.partialorder %v2882_v59, inf  ;;  %v2894_v9 = vand.u32 2147483648, %v2882_v59  ;;  %vm2893_vm5 = vcmp.eq.f32.partialorder %v2882_v59, 0.0 }
 0x958   : > { %v2881_v62 = vpop.xlane.xlu1 %2880 }
 0x959   : > { %v3635_v1 = vpop.eup %3634  ;;  %v2883_v18 = vmul.f32 %v2881_v62, %v4365_v29 }
 0x95a   : > { %v2885_v20 = vmul.f32 %v3635_v1, %v2882_v59 }
 0x95b   : > { %3636 = vrsqrt.f32 %v2883_v18  ;;  %vm2903_vm6 = vcmp.eq.f32.partialorder %v2883_v18, inf  ;;  %v2906_v47 = vand.u32 2147483648, %v2883_v18  ;;  %vm2905_vm7 = vcmp.eq.f32.partialorder %v2883_v18, 0.0 }
 0x95c   : > { %v2886_v19 = vmul.f32 %v3635_v1, %v2885_v20 }
 0x95e   : > { %v2887_v12 = vmul.f32 0.5, %v2886_v19 }
 0x960   : > { %v2888_v36 = vsub.f32 1.5, %v2887_v12 }
 0x961   : > { %v3637_v2 = vpop.eup %3636 }
 0x962   : > { %v2889_v58 = vmul.f32 %v3635_v1, %v2888_v36  ;;  %v2897_v8 = vmul.f32 %v3637_v2, %v2883_v18 }
 0x964   : > { %v2890_v7 = vmul.f32 %v2889_v58, %v2882_v59  ;;  %v2898_v38 = vmul.f32 %v3637_v2, %v2897_v8 }
 0x966   : > { %v2892_v10 = vsel %vm2891_vm4, %v2882_v59, %v2890_v7  ;;  %v2899_v43 = vmul.f32 0.5, %v2898_v38 }
 0x967   : > { %v2895_v5 = vsel %vm2893_vm5, %v2894_v9, %v2892_v10 }
 0x968   : > { %v2908_v41 = vadd.f32 1e-06, %v2895_v5  ;;  %v2900_v16 = vsub.f32 1.5, %v2899_v43 }
 0x96a   : > { %3638 = vrcp.f32 %v2908_v41  ;;  %v2901_v29 = vmul.f32 %v3637_v2, %v2900_v16  ;;  %v2921_v27 = vand.u32 2147483648, %v2908_v41  ;;  %v2919_v31 = vand.u32 2147483647, %v2908_v41 }
 0x96b   : > { %vm2915_vm9 = vweird.f32 %v2908_v41 }
 0x96c   : > { %v2902_v13 = vmul.f32 %v2901_v29, %v2883_v18  ;;  %v2922_v33 = vor.u32 1.1754944e-38, %v2921_v27  ;;  %vm2920_vm11 = vcmp.eq.f32.partialorder %v2919_v31, 8.507059e+37 }
 0x96e   : > { %v2904_v53 = vsel %vm2903_vm6, %v2883_v18, %v2902_v13 }
 0x96f   : > { %v2907_v23 = vsel %vm2905_vm7, %v2906_v47, %v2904_v53 }
 0x970   : > { %v3639_v14 = vpop.eup %3638  ;;  %v2909_v25 = vadd.f32 1e-06, %v2907_v23 }
 0x971   : > { %v2911_v52 = vmul.f32 %v3639_v14, %v2908_v41  ;;  %vm2916_vm8 = vweird.f32 %v3639_v14 }
 0x972   : > { %3640 = vrcp.f32 %v2909_v25  ;;  %vm2917_vm10 = vmor %vm2915_vm9, %vm2916_vm8  ;;  %v2935_v63 = vand.u32 2147483648, %v2909_v25  ;;  %v2933_v28 = vand.u32 2147483647, %v2909_v25  ;;  %vm2929_vm13 = vweird.f32 %v2909_v25 }
 0x973   : > { %v2912_v56 = vsub.f32 1.0, %v2911_v52 }
 0x974   : > { %v2936_v45 = vor.u32 1.1754944e-38, %v2935_v63  ;;  %vm2934_vm15 = vcmp.eq.f32.partialorder %v2933_v28, 8.507059e+37 }
 0x975   : > { %v2913_v24 = vmul.f32 %v3639_v14, %v2912_v56 }
 0x977   : > { %v2914_v32 = vadd.f32 %v3639_v14, %v2913_v24 }
 0x978   : > { %v3641_v15 = vpop.eup %3640 }
 0x979   : > { %v2918_v60 = vsel %vm2917_vm10, %v3639_v14, %v2914_v32  ;;  %v2925_v34 = vmul.f32 %v3641_v15, %v2909_v25  ;;  %vm2930_vm12 = vweird.f32 %v3641_v15 }
 0x97a   : > { %v2923_v44 = vsel %vm2920_vm11, %v2922_v33, %v2918_v60  ;;  %vm2931_vm14 = vmor %vm2929_vm13, %vm2930_vm12 }
 0x97b   : > { %v2938_v26 = vmul.f32 %v2923_v44, %v2872_v50  ;;  %v2926_v37 = vsub.f32 1.0, %v2925_v34 }
 0x97d   : > { %v2943_v6 = vmul.f32 %v3632_v61, %v2938_v26  ;;  %v2927_v48 = vmul.f32 %v3641_v15, %v2926_v37 }
 0x97f   : > { %v2948_v3 = vadd.f32 %v3633_v35, %v2943_v6  ;;  %v2928_v40 = vadd.f32 %v3641_v15, %v2927_v48 }
 0x981   : > { %2950 = vst.msk [vmem:[%s4342_s0] sm:$0xff] %vm1013_vm1, %v2948_v3  ;;  %v2932_v11 = vsel %vm2931_vm14, %v3641_v15, %v2928_v40 }
 0x982   : > { %v2937_v46 = vsel %vm2934_vm15, %v2936_v45, %v2932_v11 }
 0x983   : > { %v2939_v4 = vmul.f32 %v2937_v46, %v5015_v0 }
 0x985   : > { %v2944_v42 = vmul.f32 %v3632_v61, %v2939_v4 }
 0x987   : > { %v2949_v22 = vadd.f32 %v3633_v35, %v2944_v42 }
 0x989   : > { %2951 = vst.msk [vmem:[%s4342_s0 + $0x8] sm:$0xff] %vm1013_vm1, %v2949_v22 }
 0x98a PF: > { %s5212_s19 = sld [smem:[#allocation20_spill]]  ;;  %s3392_s28 = sshll.u32 %s3944_s23, 4 }
 0x98b   : > { %s5214_s18 = sld [smem:[#allocation53_spill]]  ;;  %s2965_s12 = sshll.u32 %s4342_s0, 4  ;;  %s2966_s12 = int_to_ptr.vmem [resolvable:$true] %s2965_s12 }
 0x990   : > { %s5215_s9 = sand.u32 1, %s5212_s19  }
 0x991   : > { %s2964_s26 = scalar_lea.hbm %s5214_s18, %s3392_s28  ;;  %s2953_s2 = scalar_lea.sflag [#allocation4], %s5215_s9 }
 0x992   : > { %s2967_s13 = sshll.u32 %s2964_s26, 4  ;;  %s3842_s23 = scalar_lea.hbm %s5214_s18, 32  ;;  %s2968_s13 = int_to_ptr.hbm [resolvable:$true] %s2967_s13 }
 0x993   : > { %s3836_s5 = sshra.s32 %s2968_s13, 4  ;;  %s3837_s5 = int_to_ptr.hbm [resolvable:$true] %s3836_s5 }
 0x994   : > { %s3838_s29 = scalar_lea.hbm %s3837_s5, 16  ;;  %p3843_p4 = scmp.lt.s32.totalorder %s3837_s5, %s5214_s18 }
 0x995   : > { %p3839_p13 = scmp.ne.s32.totalorder %s3837_s5, %s3838_s29  ;;  %p3844_p3 = scmp.lt.s32.totalorder %s3842_s23, %s3838_s29 }
 0x997   : > { %p3840_p0 = pnand %p3839_p13, %p4163_p12  ;;  %p3845_p5 = por %p3844_p3, %p3843_p4 }
 0x999   : > { %p3841_p1 = pneg %p3840_p0 }
 0x99b   : > { %p3846_p6 = pnand %p3845_p5, %p3841_p1 }
 0x99d   : > { %3849 = shalt.err (!%p3846_p6)
}
 0x99e   : > { %s3970_s0 = smov 128  }
 0x99f   : > { %3405 = dma.vmem_to_hbm [thread:$0]  (%p4163_p12), %s2966_s12, 256, %s2968_s13, %s2953_s2, %s3970_s0, %s3970_s0, %s3969_s10  }
 0x9a0 PF: > { %s5216_s15 = sld [smem:[#allocation27_spill]] }
 0x9a1   : > { %s5217_s24 = sld [smem:[#allocation19_spill]] }
 0x9a6   : > { %p3431_p7 = scmp.ge.s32.totalorder %s5216_s15, 2 }
 0x9a7   : > { %s2982_s7 = sand.u32 1, %s5217_s24  }
 0x9a8   : > { %p3427_p9 = pnand %p3431_p7, %p4173_p2  ;;  %s2983_s21 = scalar_lea.sflag [#allocation4], %s2982_s7 }
 0x9aa   : > { %p3428_p8 = pneg %p3427_p9 }
 0x9ac   : > { %3911 = dma.done.wait (%p3428_p8), %s2983_s21, 256  }
 0x9ad   : > { %3913 = vsyncadd (%p3428_p8), %s2983_s21, 4294967040  ;;  %s44_s3 = sadd.s32 1, %s5216_s15   ;;  %s5219_s0 = sld [smem:[#allocation20_spill]] }
 0x9ae   : > { %p41_p10 = scmp.ge.s32.totalorder %s44_s3, 6   ;;  %s5220_s30 = sld [smem:[#allocation21_spill]] }
 0x9af   : > { %s5221_s20 = sld [smem:[#allocation31_spill]] }
 0x9b0   : > { %s5222_s21 = sld [smem:[#allocation22_spill]] }
 0x9b1   : > { %s5223_s1 = sld [smem:[#allocation23_spill]] }
 0x9b2   : > { %s5224_s22 = sld [smem:[#allocation30_spill]]  ;;  %43 = sbr.rel (!%p41_p10) target bundleno = 36 (0x24), region = 247 }
 0x9b3   : > { %s5225_s2 = sld [smem:[#allocation25_spill]] }
 0x9b4   : > { %s5226_s23 = sld [smem:[#allocation26_spill]] }
 0x9b5   : > { %s5227_s24 = sld [smem:[#allocation28_spill]] }
 0x9b6   : > { %s5228_s25 = sld [smem:[#allocation29_spill]] }
 0x9b7   :  { %2989 = vsyncpa [#allocation3], 1 }
 0x9b8   :  { %2991 = vsyncpa [#allocation3 + $0x1], 1 }
 0x9b9   :  { %2992 = vsyncpa [#allocation6], 1 }
 0x9ba   :  { %2994 = vsyncpa [#allocation6 + $0x1], 1 }
 0x9bb   :  { %2995 = vsyncpa [#allocation9], 1 }
 0x9bc   :  { %2997 = vsyncpa [#allocation9 + $0x1], 1 }
 0x9bd   :  { %2998 = vsyncpa [#allocation12], 1 }
 0x9be   :  { %3000 = vsyncpa [#allocation12 + $0x1], 1 }
 0x9bf   :  { %3001 = vsyncpa [#allocation4], 1 }
 0x9c0   :  { %3003 = vsyncpa [#allocation4 + $0x1], 1 }

</bundles_post_ra>
